<compile_context>
chip_gen: v7x
topology: tpu7x:2x2x1
jax: 0.10.0
libtpu: 0.0.40
codegen_flags: <defaults>
</compile_context>

<pallas_src>
import jax
import jax.numpy as jnp
from jax import lax
from jax.experimental import pallas as pl
from jax.experimental.pallas import tpu as pltpu


def _round_up(x, m):
    return (x + m - 1) // m * m


def _nbytes(shape, dtype):
    n = 1
    for s in shape:
        n *= s
    return n * jnp.dtype(dtype).itemsize


# -----------------------------------------------------------------------------
# Kernel: one batch tile (bm rows) x one K slab (bk input features) per step.
#   layer1: acc += x @ (w1_mean + n1 * w1_std).T          (bf16 MXU, f32 acc)
#   on last K slab: h = relu(acc + b1); y = h @ (w2_mean + n2 * w2_std).T + b2
# Perturbation math is done in f32 (v5e-safe), MXU inputs are bf16.
# -----------------------------------------------------------------------------
def _stoch_mlp_kernel(x_ref,                    # (bm, bk)             bf16
                      w1m_ref, w1n_ref, w1s_ref,  # (d_hidden_p, bk)   bf16
                      b1_ref,                   # (1, d_hidden_p)      f32 (already perturbed)
                      w2m_ref, w2n_ref, w2s_ref,  # (d_out_p, d_hidden_p) bf16
                      b2_ref,                   # (1, d_out_p)         f32 (already perturbed)
                      o_ref,                    # (bm, d_out_p)        f32
                      acc_ref):                 # (bm, d_hidden_p)     f32 scratch
    k = pl.program_id(1)
    last_k = pl.num_programs(1) - 1

    @pl.when(k == 0)
    def _():
        acc_ref[...] = jnp.zeros_like(acc_ref)

    # ---- layer-1 K slab: stochastic weight tile + partial matmul -----------
    w1 = (w1m_ref[...].astype(jnp.float32)
          + w1n_ref[...].astype(jnp.float32) * w1s_ref[...].astype(jnp.float32))
    acc_ref[...] += lax.dot_general(
        x_ref[...],                              # already bf16
        w1.astype(jnp.bfloat16),
        dimension_numbers=(((1,), (1,)), ((), ())),   # x @ w1.T, no transpose op
        preferred_element_type=jnp.float32)

    # ---- last K slab: bias1 + ReLU + stochastic layer 2 ---------------------
    @pl.when(k == last_k)
    def _():
        h = jnp.maximum(acc_ref[...] + b1_ref[...], 0.0)
        w2 = (w2m_ref[...].astype(jnp.float32)
              + w2n_ref[...].astype(jnp.float32) * w2s_ref[...].astype(jnp.float32))
        y = lax.dot_general(
            h.astype(jnp.bfloat16), w2.astype(jnp.bfloat16),
            dimension_numbers=(((1,), (1,)), ((), ())),
            preferred_element_type=jnp.float32) + b2_ref[...]
        o_ref[...] = y


# -----------------------------------------------------------------------------
# One-time parameter preparation: pad to TPU-friendly shapes, precompute
# std = exp(scale), cast weight streams to bf16.  Done once, reused per call.
# -----------------------------------------------------------------------------
def prepare_params(params, *, block_k=512, single_k_budget_bytes=24 << 20):
    w1m, w1s = params["w1_mean"], params["w1_scale"]   # (d_hidden, d_in)  torch layout
    w2m, w2s = params["w2_mean"], params["w2_scale"]   # (d_out, d_hidden)
    d_hidden, d_in = w1m.shape
    d_out = w2m.shape[0]
    assert w2m.shape[1] == d_hidden

    d_hidden_p = _round_up(d_hidden, 128)
    d_out_p = _round_up(d_out, 128)
    d_in_128 = _round_up(d_in, 128)

    # Whole-K tiling whenever the (double-buffered) w1 mean/noise/std stream
    # fits the budget -> 1-step reduction, w1 DMA'd once per batch tile.
    w1_stream_bytes = 3 * 2 * d_hidden_p * d_in_128 * 2   # bf16
    if w1_stream_bytes <= single_k_budget_bytes:
        bk = d_in_128
    else:
        bk = _round_up(min(block_k, d_in_128), 128)
    d_in_p = _round_up(d_in_128, bk)

    def pad2(a, rows, cols, fill=0.0):
        pr, pc = rows - a.shape[0], cols - a.shape[1]
        if pr == 0 and pc == 0:
            return a
        return jnp.pad(a, ((0, pr), (0, pc)), constant_values=fill)

    f32 = jnp.float32
    prepped = {
        # weight streams in bf16, std precomputed (0-fill in padding -> padded
        # region contributes exactly zero regardless of the padded noise).
        "w1m": pad2(w1m.astype(f32), d_hidden_p, d_in_p).astype(jnp.bfloat16),
        "w1std": pad2(jnp.exp(w1s.astype(f32)), d_hidden_p, d_in_p).astype(jnp.bfloat16),
        "w2m": pad2(w2m.astype(f32), d_out_p, d_hidden_p).astype(jnp.bfloat16),
        "w2std": pad2(jnp.exp(w2s.astype(f32)), d_out_p, d_hidden_p).astype(jnp.bfloat16),
        # biases are tiny -> stay f32
        "b1m": pad2(params["b1_mean"].astype(f32).reshape(1, d_hidden), 1, d_hidden_p),
        "b1std": pad2(jnp.exp(params["b1_scale"].astype(f32)).reshape(1, d_hidden), 1, d_hidden_p),
        "b2m": pad2(params["b2_mean"].astype(f32).reshape(1, d_out), 1, d_out_p),
        "b2std": pad2(jnp.exp(params["b2_scale"].astype(f32)).reshape(1, d_out), 1, d_out_p),
        "dims": (d_in, d_hidden, d_out),
        "padded": (d_in_p, d_hidden_p, d_out_p),
        "bk": bk,
    }
    return prepped


# -----------------------------------------------------------------------------
# Forward pass.  Fresh N(0,1) noise per call (mirrors StochLin.stoch_forward's
# torch.randn), drawn once for the whole forward and shared by every batch tile.
# -----------------------------------------------------------------------------
def stoch_mlp_forward(x, prepped, key, *, return_noise=False):
    d_in, d_hidden, d_out = prepped["dims"]
    d_in_p, d_hidden_p, d_out_p = prepped["padded"]
    bk = prepped["bk"]
    n_k = d_in_p // bk

    B = x.shape[0]
    x2d = x.reshape(B, -1)
    assert x2d.shape[1] == d_in, f"flattened d_in mismatch: {x2d.shape[1]} vs {d_in}"

    # batch tiling: 128-wide tiles (v5e-safe; raise to 256 on v6e for big B)
    bm = _round_up(B, 8) if B <= 128 else 128
    B_p = _round_up(B, bm)
    n_m = B_p // bm

    # bf16 input stream (it is cast to bf16 before the MXU anyway)
    x_p = jnp.pad(x2d.astype(jnp.bfloat16), ((0, B_p - B), (0, d_in_p - d_in)))

    # ---- noise (global element coordinates -> tiling-independent) ----------
    k1, k2, k3, k4 = jax.random.split(key, 4)
    nw1 = jax.random.normal(k1, (d_hidden_p, d_in_p), jnp.float32).astype(jnp.bfloat16)
    nw2 = jax.random.normal(k3, (d_out_p, d_hidden_p), jnp.float32).astype(jnp.bfloat16)
    nb1 = jax.random.normal(k2, (1, d_hidden_p), jnp.float32)
    nb2 = jax.random.normal(k4, (1, d_out_p), jnp.float32)

    # stochastic biases are tiny -> perturb in the wrapper (exact f32)
    b1 = prepped["b1m"] + nb1 * prepped["b1std"]
    b2 = prepped["b2m"] + nb2 * prepped["b2std"]

    in_specs = [
        pl.BlockSpec((bm, bk), lambda i, k: (i, k)),                # x
        pl.BlockSpec((d_hidden_p, bk), lambda i, k: (0, k)),        # w1_mean
        pl.BlockSpec((d_hidden_p, bk), lambda i, k: (0, k)),        # w1 noise
        pl.BlockSpec((d_hidden_p, bk), lambda i, k: (0, k)),        # w1 std
        pl.BlockSpec((1, d_hidden_p), lambda i, k: (0, 0)),         # b1 (perturbed)
        pl.BlockSpec((d_out_p, d_hidden_p), lambda i, k: (0, 0)),   # w2_mean
        pl.BlockSpec((d_out_p, d_hidden_p), lambda i, k: (0, 0)),   # w2 noise
        pl.BlockSpec((d_out_p, d_hidden_p), lambda i, k: (0, 0)),   # w2 std
        pl.BlockSpec((1, d_out_p), lambda i, k: (0, 0)),            # b2 (perturbed)
    ]
    out_spec = pl.BlockSpec((bm, d_out_p), lambda i, k: (i, 0))     # lane-dense output

    # VMEM budget: double-buffered resident blocks + accumulator, 3x headroom
    # for f32 perturbation temporaries, clamped under v7x's 64 MiB/TC.
    resident = (2 * _nbytes((bm, bk), jnp.bfloat16)
                + 2 * 3 * _nbytes((d_hidden_p, bk), jnp.bfloat16)
                + 2 * _nbytes((1, d_hidden_p), jnp.float32)
                + 2 * 3 * _nbytes((d_out_p, d_hidden_p), jnp.bfloat16)
                + 2 * _nbytes((1, d_out_p), jnp.float32)
                + 2 * _nbytes((bm, d_out_p), jnp.float32)
                + _nbytes((bm, d_hidden_p), jnp.float32))
    vmem_limit = int(min(max(3 * resident, 32 << 20), 56 << 20))

    out = pl.pallas_call(
        _stoch_mlp_kernel,
        grid=(n_m, n_k),
        in_specs=in_specs,
        out_specs=out_spec,
        out_shape=jax.ShapeDtypeStruct((B_p, d_out_p), jnp.float32),
        scratch_shapes=[pltpu.VMEM((bm, d_hidden_p), jnp.float32)],
        compiler_params=pltpu.CompilerParams(
            dimension_semantics=("parallel", "arbitrary"),
            vmem_limit_bytes=vmem_limit),
    )(x_p, prepped["w1m"], nw1, prepped["w1std"], b1,
      prepped["w2m"], nw2, prepped["w2std"], b2)

    y = out[:B, :d_out]
    if not return_noise:
        return y
    noise = {"w1": nw1, "b1": nb1, "w2": nw2, "b2": nb2}
    return y, noise


# -----------------------------------------------------------------------------
# Parameter init mirroring StochLin.__init__ (trunc-normal weight means, full
# scale/bias constants).  Stored f32 like the torch module; prepare_params does
# the one-time pad / exp(scale) / bf16 conversion.
# -----------------------------------------------------------------------------
def init_params(key, d_in, d_hidden, d_out, scale=-3.0, bias=0.0,
                norm_mean=0.0, norm_stdv=0.1, trunc_min=-0.2, trunc_max=0.2):
    k1, k2 = jax.random.split(key)
    lo = (trunc_min - norm_mean) / norm_stdv
    hi = (trunc_max - norm_mean) / norm_stdv
    w1_mean = norm_mean + norm_stdv * jax.random.truncated_normal(
        k1, lo, hi, (d_hidden, d_in), jnp.float32)
    w2_mean = norm_mean + norm_stdv * jax.random.truncated_normal(
        k2, lo, hi, (d_out, d_hidden), jnp.float32)
    return {
        "w1_mean": w1_mean,
        "w1_scale": jnp.full((d_hidden, d_in), scale, jnp.float32),
        "b1_mean": jnp.full((d_hidden,), bias, jnp.float32),
        "b1_scale": jnp.full((d_hidden,), scale, jnp.float32),
        "w2_mean": w2_mean,
        "w2_scale": jnp.full((d_out, d_hidden), scale, jnp.float32),
        "b2_mean": jnp.full((d_out,), bias, jnp.float32),
        "b2_scale": jnp.full((d_out,), scale, jnp.float32),
    }


if __name__ == "__main__":
    key = jax.random.PRNGKey(0)
    k_x, k_p, k_n = jax.random.split(key, 3)

    B, C, H, W = 2, 4, 16, 16                  # x.flatten(1) -> (2, 1024)
    d_in, d_hidden, d_out = C * H * W, 32, 10

    x = jax.random.normal(k_x, (B, C, H, W), jnp.float32)
    params = init_params(k_p, d_in, d_hidden, d_out)
    prepped = prepare_params(params)           # one-time pad / exp(scale) / bf16

    y, noise = stoch_mlp_forward(x, prepped, k_n, return_noise=True)
    jax.block_until_ready(y)

    # ---- pure-JAX reference with the same noise, mimicking the kernel's
    # bf16 MXU inputs / f32 accumulation --------------------------------------
    bfr = lambda a: a.astype(jnp.bfloat16).astype(jnp.float32)   # bf16 rounding
    x2d = x.reshape(B, -1)
    nw1 = bfr(noise["w1"][:d_hidden, :d_in])
    nw2 = bfr(noise["w2"][:d_out, :d_hidden])
    nb1 = noise["b1"][0, :d_hidden]
    nb2 = noise["b2"][0, :d_out]

    w1 = bfr(bfr(params["w1_mean"]) + nw1 * bfr(jnp.exp(params["w1_scale"])))
    b1 = params["b1_mean"] + nb1 * jnp.exp(params["b1_scale"])
    w2 = bfr(bfr(params["w2_mean"]) + nw2 * bfr(jnp.exp(params["w2_scale"])))
    b2 = params["b2_mean"] + nb2 * jnp.exp(params["b2_scale"])

    h = jnp.maximum(bfr(x2d) @ w1.T + b1, 0.0)
    y_ref = bfr(h) @ w2.T + b2

    assert y.shape == (B, d_out)
    assert bool(jnp.all(jnp.isfinite(y)))
    max_err = float(jnp.max(jnp.abs(y - y_ref)))
    assert jnp.allclose(y, y_ref, atol=2e-2, rtol=2e-2), f"mismatch vs reference: {max_err}"
    print("KERNEL_OK")
</pallas_src>

<mosaic_0001>
module attributes {stable_mosaic.version = 11 : i64} {
  func.func @_stoch_mlp_kernel(%arg0: i32, %arg1: i32, %arg2: memref<8x1024xbf16, #tpu.memory_space<vmem>>, %arg3: memref<128x1024xbf16, #tpu.memory_space<vmem>>, %arg4: memref<128x1024xbf16, #tpu.memory_space<vmem>>, %arg5: memref<128x1024xbf16, #tpu.memory_space<vmem>>, %arg6: memref<1x128xf32, #tpu.memory_space<vmem>>, %arg7: memref<128x128xbf16, #tpu.memory_space<vmem>>, %arg8: memref<128x128xbf16, #tpu.memory_space<vmem>>, %arg9: memref<128x128xbf16, #tpu.memory_space<vmem>>, %arg10: memref<1x128xf32, #tpu.memory_space<vmem>>, %arg11: memref<8x128xf32, #tpu.memory_space<vmem>>, %arg12: memref<8x128xf32, #tpu.memory_space<vmem>>) attributes {dimension_semantics = [#tpu.dimension_semantics<parallel>, #tpu.dimension_semantics<arbitrary>], iteration_bounds = array<i64: 1, 1>, scalar_prefetch = 0 : i64, scratch_operands = 1 : i64, tpu.core_type = #tpu.core_type<tc>, window_params = [{transform_indices = @transform_0, window_bounds = array<i64: 8, 1024>}, {transform_indices = @transform_1, window_bounds = array<i64: 128, 1024>}, {transform_indices = @transform_2, window_bounds = array<i64: 128, 1024>}, {transform_indices = @transform_3, window_bounds = array<i64: 128, 1024>}, {pipeline_mode = #tpu.pipeline_mode<synchronous>, transform_indices = @transform_4, window_bounds = array<i64: 1, 128>}, {pipeline_mode = #tpu.pipeline_mode<synchronous>, transform_indices = @transform_5, window_bounds = array<i64: 128, 128>}, {pipeline_mode = #tpu.pipeline_mode<synchronous>, transform_indices = @transform_6, window_bounds = array<i64: 128, 128>}, {pipeline_mode = #tpu.pipeline_mode<synchronous>, transform_indices = @transform_7, window_bounds = array<i64: 128, 128>}, {pipeline_mode = #tpu.pipeline_mode<synchronous>, transform_indices = @transform_8, window_bounds = array<i64: 1, 128>}, {transform_indices = @transform_9, window_bounds = array<i64: 8, 128>}]} {
    %c0_i32 = arith.constant 0 : i32
    %0 = arith.cmpi eq, %arg1, %c0_i32 : i32
    %1 = arith.extui %0 : i1 to i32
    %c0_i32_0 = arith.constant 0 : i32
    %2 = arith.cmpi ne, %1, %c0_i32_0 : i32
    scf.if %2 {
      %cst_14 = arith.constant 0.000000e+00 : f32
      %20 = vector.broadcast %cst_14 : f32 to vector<8x128xf32>
      %c0_15 = arith.constant 0 : index
      %c0_16 = arith.constant 0 : index
      %21 = vector.load %arg12[%c0_15, %c0_16] : memref<8x128xf32, #tpu.memory_space<vmem>>, vector<8x128xf32>
      tpu.vector_store %arg12[%c0_15, %c0_16], %20 {strides = array<i32>} : memref<8x128xf32, #tpu.memory_space<vmem>>, vector<8x128xf32>,
    } else {
    }
    %c0 = arith.constant 0 : index
    %c0_1 = arith.constant 0 : index
    %3 = vector.load %arg3[%c0, %c0_1] : memref<128x1024xbf16, #tpu.memory_space<vmem>>, vector<128x1024xbf16>
    %4 = arith.extf %3 : vector<128x1024xbf16> to vector<128x1024xf32>
    %c0_2 = arith.constant 0 : index
    %c0_3 = arith.constant 0 : index
    %5 = vector.load %arg4[%c0_2, %c0_3] : memref<128x1024xbf16, #tpu.memory_space<vmem>>, vector<128x1024xbf16>
    %6 = arith.extf %5 : vector<128x1024xbf16> to vector<128x1024xf32>
    %c0_4 = arith.constant 0 : index
    %c0_5 = arith.constant 0 : index
    %7 = vector.load %arg5[%c0_4, %c0_5] : memref<128x1024xbf16, #tpu.memory_space<vmem>>, vector<128x1024xbf16>
    %8 = arith.extf %7 : vector<128x1024xbf16> to vector<128x1024xf32>
    %9 = arith.mulf %6, %8 : vector<128x1024xf32>
    %10 = arith.addf %4, %9 : vector<128x1024xf32>
    %c0_6 = arith.constant 0 : index
    %c0_7 = arith.constant 0 : index
    %11 = vector.load %arg12[%c0_6, %c0_7] : memref<8x128xf32, #tpu.memory_space<vmem>>, vector<8x128xf32>
    %c0_8 = arith.constant 0 : index
    %c0_9 = arith.constant 0 : index
    %12 = vector.load %arg2[%c0_8, %c0_9] : memref<8x1024xbf16, #tpu.memory_space<vmem>>, vector<8x1024xbf16>
    %13 = arith.truncf %10 : vector<128x1024xf32> to vector<128x1024xbf16>
    %cst = arith.constant dense<0.000000e+00> : vector<8x128xf32>
    %14 = tpu.matmul %12, %13, %cst {dimension_numbers = #tpu.dot_dimension_numbers<[1], [1], [0], [0], [0, 0, 1, 0], [], []>} : vector<8x1024xbf16>, vector<128x1024xbf16>, vector<8x128xf32> -> vector<8x128xf32>
    %15 = arith.addf %11, %14 : vector<8x128xf32>
    %c0_10 = arith.constant 0 : index
    %c0_11 = arith.constant 0 : index
    %16 = vector.load %arg12[%c0_10, %c0_11] : memref<8x128xf32, #tpu.memory_space<vmem>>, vector<8x128xf32>
    tpu.vector_store %arg12[%c0_10, %c0_11], %15 {strides = array<i32>} : memref<8x128xf32, #tpu.memory_space<vmem>>, vector<8x128xf32>,
    %c0_i32_12 = arith.constant 0 : i32
    %17 = arith.cmpi eq, %arg1, %c0_i32_12 : i32
    %18 = arith.extui %17 : i1 to i32
    %c0_i32_13 = arith.constant 0 : i32
    %19 = arith.cmpi ne, %18, %c0_i32_13 : i32
    scf.if %19 {
      %c0_14 = arith.constant 0 : index
      %c0_15 = arith.constant 0 : index
      %20 = vector.load %arg12[%c0_14, %c0_15] : memref<8x128xf32, #tpu.memory_space<vmem>>, vector<8x128xf32>
      %c0_16 = arith.constant 0 : index
      %c0_17 = arith.constant 0 : index
      %21 = vector.load %arg6[%c0_16, %c0_17] : memref<1x128xf32, #tpu.memory_space<vmem>>, vector<1x128xf32>
      %22 = vector.broadcast %21 : vector<1x128xf32> to vector<8x128xf32>
      %23 = arith.addf %20, %22 : vector<8x128xf32>
      %cst_18 = arith.constant 0.000000e+00 : f32
      %24 = vector.broadcast %cst_18 : f32 to vector<8x128xf32>
      %25 = arith.maximumf %23, %24 : vector<8x128xf32>
      %c0_19 = arith.constant 0 : index
      %c0_20 = arith.constant 0 : index
      %26 = vector.load %arg7[%c0_19, %c0_20] : memref<128x128xbf16, #tpu.memory_space<vmem>>, vector<128x128xbf16>
      %27 = arith.extf %26 : vector<128x128xbf16> to vector<128x128xf32>
      %c0_21 = arith.constant 0 : index
      %c0_22 = arith.constant 0 : index
      %28 = vector.load %arg8[%c0_21, %c0_22] : memref<128x128xbf16, #tpu.memory_space<vmem>>, vector<128x128xbf16>
      %29 = arith.extf %28 : vector<128x128xbf16> to vector<128x128xf32>
      %c0_23 = arith.constant 0 : index
      %c0_24 = arith.constant 0 : index
      %30 = vector.load %arg9[%c0_23, %c0_24] : memref<128x128xbf16, #tpu.memory_space<vmem>>, vector<128x128xbf16>
      %31 = arith.extf %30 : vector<128x128xbf16> to vector<128x128xf32>
      %32 = arith.mulf %29, %31 : vector<128x128xf32>
      %33 = arith.addf %27, %32 : vector<128x128xf32>
      %34 = arith.truncf %25 : vector<8x128xf32> to vector<8x128xbf16>
      %35 = arith.truncf %33 : vector<128x128xf32> to vector<128x128xbf16>
      %cst_25 = arith.constant dense<0.000000e+00> : vector<8x128xf32>
      %36 = tpu.matmul %34, %35, %cst_25 {dimension_numbers = #tpu.dot_dimension_numbers<[1], [1], [0], [0], [0, 0, 1, 0], [], []>} : vector<8x128xbf16>, vector<128x128xbf16>, vector<8x128xf32> -> vector<8x128xf32>
      %c0_26 = arith.constant 0 : index
      %c0_27 = arith.constant 0 : index
      %37 = vector.load %arg10[%c0_26, %c0_27] : memref<1x128xf32, #tpu.memory_space<vmem>>, vector<1x128xf32>
      %38 = vector.broadcast %37 : vector<1x128xf32> to vector<8x128xf32>
      %39 = arith.addf %36, %38 : vector<8x128xf32>
      %c0_28 = arith.constant 0 : index
      %c0_29 = arith.constant 0 : index
      %40 = vector.load %arg11[%c0_28, %c0_29] : memref<8x128xf32, #tpu.memory_space<vmem>>, vector<8x128xf32>
      tpu.vector_store %arg11[%c0_28, %c0_29], %39 {strides = array<i32>} : memref<8x128xf32, #tpu.memory_space<vmem>>, vector<8x128xf32>,
    } else {
    }
    return
  }
  func.func @transform_0(%arg0: i32, %arg1: i32) -> (i32, i32) {
    %c0_i32 = arith.constant 0 : i32
    return %arg0, %arg1 : i32, i32
  }
  func.func @transform_1(%arg0: i32, %arg1: i32) -> (i32, i32) {
    %c0_i32 = arith.constant 0 : i32
    %c0_i32_0 = arith.constant 0 : i32
    return %c0_i32, %arg1 : i32, i32
  }
  func.func @transform_2(%arg0: i32, %arg1: i32) -> (i32, i32) {
    %c0_i32 = arith.constant 0 : i32
    %c0_i32_0 = arith.constant 0 : i32
    return %c0_i32, %arg1 : i32, i32
  }
  func.func @transform_3(%arg0: i32, %arg1: i32) -> (i32, i32) {
    %c0_i32 = arith.constant 0 : i32
    %c0_i32_0 = arith.constant 0 : i32
    return %c0_i32, %arg1 : i32, i32
  }
  func.func @transform_4(%arg0: i32, %arg1: i32) -> (i32, i32) {
    %c0_i32 = arith.constant 0 : i32
    %c0_i32_0 = arith.constant 0 : i32
    %c0_i32_1 = arith.constant 0 : i32
    return %c0_i32, %c0_i32_0 : i32, i32
  }
  func.func @transform_5(%arg0: i32, %arg1: i32) -> (i32, i32) {
    %c0_i32 = arith.constant 0 : i32
    %c0_i32_0 = arith.constant 0 : i32
    %c0_i32_1 = arith.constant 0 : i32
    return %c0_i32, %c0_i32_0 : i32, i32
  }
  func.func @transform_6(%arg0: i32, %arg1: i32) -> (i32, i32) {
    %c0_i32 = arith.constant 0 : i32
    %c0_i32_0 = arith.constant 0 : i32
    %c0_i32_1 = arith.constant 0 : i32
    return %c0_i32, %c0_i32_0 : i32, i32
  }
  func.func @transform_7(%arg0: i32, %arg1: i32) -> (i32, i32) {
    %c0_i32 = arith.constant 0 : i32
    %c0_i32_0 = arith.constant 0 : i32
    %c0_i32_1 = arith.constant 0 : i32
    return %c0_i32, %c0_i32_0 : i32, i32
  }
  func.func @transform_8(%arg0: i32, %arg1: i32) -> (i32, i32) {
    %c0_i32 = arith.constant 0 : i32
    %c0_i32_0 = arith.constant 0 : i32
    %c0_i32_1 = arith.constant 0 : i32
    return %c0_i32, %c0_i32_0 : i32, i32
  }
  func.func @transform_9(%arg0: i32, %arg1: i32) -> (i32, i32) {
    %c0_i32 = arith.constant 0 : i32
    %c0_i32_0 = arith.constant 0 : i32
    return %arg0, %c0_i32 : i32, i32
  }
}

</mosaic_0001>

<bundles_post_ra>
// kernel: tpu_custom_call.1
= control target key start
LH: loop header
LB: loop body
LE: loop exit
PB: predicated region body
PF: predicated region fallthrough
CT: control target
= control target key end

     0   :  { %14 = vsyncpa [#allocation4], 0  ;;  %s2217_s0 = inlined_call_operand.hbm [shape: bf16[8,1024], index: 0, kind: input, shape index: {}]   ;;  %s2218_s1 = inlined_call_operand.hbm [shape: bf16[128,1024], index: 1, kind: input, shape index: {}]   ;;  %s2219_s2 = inlined_call_operand.hbm [shape: bf16[128,1024], index: 2, kind: input, shape index: {}]   ;;  %s2220_s3 = inlined_call_operand.hbm [shape: bf16[128,1024], index: 3, kind: input, shape index: {}]   ;;  %s2221_s4 = inlined_call_operand.vmem [shape: f32[1,128], index: 4, kind: input, shape index: {}]   ;;  %s2222_s5 = inlined_call_operand.hbm [shape: bf16[128,128], index: 5, kind: input, shape index: {}]   ;;  %s2223_s6 = inlined_call_operand.hbm [shape: bf16[128,128], index: 6, kind: input, shape index: {}]   ;;  %s2224_s7 = inlined_call_operand.hbm [shape: bf16[128,128], index: 7, kind: input, shape index: {}]   ;;  %s2225_s8 = inlined_call_operand.vmem [shape: f32[1,128], index: 8, kind: input, shape index: {}]   ;;  %s2226_s9 = inlined_call_operand.hbm [shape: f32[8,128], index: 9, kind: output, shape index: {}]  }
   0x1   :  { %15 = vsyncpa [#allocation7], 0 }
   0x2   :  { %16 = vsyncpa [#allocation10], 0 }
   0x3   :  { %17 = vsyncpa [#allocation13], 0 }
   0x4   :  { %18 = vsyncpa [#allocation5], 0  ;;  %s1803_s30 = smov [#allocation6]   ;;  %s1617_s13 = scalar_lea.hbm %s2218_s1, 8192 }
   0x5   :  { %s34_s10 = sshll.u32 %s1803_s30, 4  ;;  %p1618_p0 = scmp.ne.s32.totalorder %s2218_s1, %s1617_s13  ;;  %s35_s10 = int_to_ptr.vmem [resolvable:$true] %s34_s10 }
   0x6   :  { %p1621_p1 = scmp.lt.u32.totalorder %s1617_s13, %s2218_s1 }
   0x8   :  { %p1623_p2 = pnand %p1621_p1, %p1618_p0 }
   0xa   :  { %1626 = shalt.err (!%p1623_p2)
}
   0xb   :  { %s1627_s18 = scalar_lea.vmem %s35_s10, 8192  ;;  %p1632_p4 = scmp.lt.s32.totalorder %s35_s10, %s35_s10 }
   0xc   :  { %p1628_p3 = scmp.ne.s32.totalorder %s35_s10, %s1627_s18  ;;  %p1633_p5 = scmp.lt.s32.totalorder %s1627_s18, %s1627_s18 }
   0xe   :  { %p1634_p6 = por %p1633_p5, %p1632_p4 }
  0x10   :  { %p1635_p7 = pnand %p1634_p6, %p1628_p3 }
  0x12   :  { %1638 = shalt.err (!%p1635_p7)
}
  0x13   :  { %s1804_s19 = smov 512   ;;  %s1805_s20 = smov 32  }
  0x14   :  { %40 = dma.hbm_to_vmem [thread:$0]  %s2218_s1, 8192, %s35_s10, [#allocation7], %s1804_s19, %s1804_s19, %s1805_s20  }
  0x15   :  { %s1806_s23 = smov [#allocation9]   ;;  %s1639_s27 = scalar_lea.hbm %s2220_s3, 8192 }
  0x16   :  { %s58_s24 = sshll.u32 %s1806_s23, 4  ;;  %p1640_p8 = scmp.ne.s32.totalorder %s2220_s3, %s1639_s27  ;;  %s59_s24 = int_to_ptr.vmem [resolvable:$true] %s58_s24 }
  0x17   :  { %p1643_p9 = scmp.lt.u32.totalorder %s1639_s27, %s2220_s3 }
  0x19   :  { %p1645_p10 = pnand %p1643_p9, %p1640_p8 }
  0x1b   :  { %1648 = shalt.err (!%p1645_p10)
}
  0x1c   :  { %s1649_s12 = scalar_lea.vmem %s59_s24, 8192  ;;  %p1654_p12 = scmp.lt.s32.totalorder %s59_s24, %s59_s24 }
  0x1d   :  { %p1650_p11 = scmp.ne.s32.totalorder %s59_s24, %s1649_s12  ;;  %p1655_p13 = scmp.lt.s32.totalorder %s1649_s12, %s1649_s12 }
  0x1f   :  { %p1656_p0 = por %p1655_p13, %p1654_p12 }
  0x21   :  { %p1657_p1 = pnand %p1656_p0, %p1650_p11 }
  0x23   :  { %1660 = shalt.err (!%p1657_p1)
}
  0x24   :  { %64 = dma.hbm_to_vmem [thread:$0]  %s2220_s3, 8192, %s59_s24, [#allocation10], %s1804_s19, %s1804_s19, %s1805_s20  }
  0x25   :  { %s1807_s13 = smov [#allocation12]   ;;  %s1808_s15 = smov [#allocation3]  }
  0x26   :  { %s84_s14 = sshll.u32 %s1807_s13, 4  ;;  %s25_s16 = sshll.u32 %s1808_s15, 4  ;;  %s85_s14 = int_to_ptr.vmem [resolvable:$true] %s84_s14  ;;  %s26_s16 = int_to_ptr.vmem [resolvable:$true] %s25_s16 }
  0x27   :  { %s1661_s21 = scalar_lea.hbm %s2223_s6, 1024 }
  0x28   :  { %p1662_p2 = scmp.ne.s32.totalorder %s2223_s6, %s1661_s21  ;;  %p1665_p3 = scmp.lt.u32.totalorder %s1661_s21, %s2223_s6 }
  0x2a   :  { %p1667_p4 = pnand %p1665_p3, %p1662_p2 }
  0x2c   :  { %1670 = shalt.err (!%p1667_p4)
}
  0x2d   :  { %s1671_s3 = scalar_lea.vmem %s85_s14, 1024  ;;  %p1676_p6 = scmp.lt.s32.totalorder %s85_s14, %s85_s14 }
  0x2e   :  { %p1672_p5 = scmp.ne.s32.totalorder %s85_s14, %s1671_s3  ;;  %p1677_p7 = scmp.lt.s32.totalorder %s1671_s3, %s1671_s3 }
  0x30   :  { %p1678_p8 = por %p1677_p7, %p1676_p6 }
  0x32   :  { %p1679_p9 = pnand %p1678_p8, %p1672_p5 }
  0x34   :  { %1682 = shalt.err (!%p1679_p9)
}
  0x35   :  { %s1809_s24 = smov 64   ;;  %s1810_s27 = smov 4  }
  0x36   :  { %90 = dma.hbm_to_vmem [thread:$0]  %s2223_s6, 1024, %s85_s14, [#allocation13], %s1809_s24, %s1809_s24, %s1810_s27  }
  0x37   :  { %s1683_s12 = scalar_lea.hbm %s2217_s0, 512 }
  0x38   :  { %p1684_p10 = scmp.ne.s32.totalorder %s2217_s0, %s1683_s12  ;;  %p1687_p11 = scmp.lt.u32.totalorder %s1683_s12, %s2217_s0 }
  0x3a   :  { %p1689_p12 = pnand %p1687_p11, %p1684_p10 }
  0x3c   :  { %1692 = shalt.err (!%p1689_p12)
}
  0x3d   :  { %s1693_s17 = scalar_lea.vmem %s26_s16, 512  ;;  %p1698_p0 = scmp.lt.s32.totalorder %s26_s16, %s26_s16 }
  0x3e   :  { %p1694_p13 = scmp.ne.s32.totalorder %s26_s16, %s1693_s17  ;;  %p1699_p1 = scmp.lt.s32.totalorder %s1693_s17, %s1693_s17 }
  0x40   :  { %p1700_p2 = por %p1699_p1, %p1698_p0 }
  0x42   :  { %p1701_p3 = pnand %p1700_p2, %p1694_p13 }
  0x44   :  { %1704 = shalt.err (!%p1701_p3)
}
  0x45   :  { %28 = dma.hbm_to_vmem [thread:$0]  %s2217_s0, 512, %s26_s16, [#allocation4]  }
  0x46   :  { %s1811_s18 = smov [#allocation8]   ;;  %s1812_s22 = smov [#allocation11]  }
  0x47   :  { %s46_s21 = sshll.u32 %s1811_s18, 4  ;;  %s72_s23 = sshll.u32 %s1812_s22, 4  ;;  %s47_s21 = int_to_ptr.vmem [resolvable:$true] %s46_s21  ;;  %s1924_s23 = int_to_ptr.vmem [resolvable:$true] %s72_s23 }
  0x48   :  { %s1705_s3 = scalar_lea.hbm %s2219_s2, 8192 }
  0x49   :  { %p1706_p4 = scmp.ne.s32.totalorder %s2219_s2, %s1705_s3  ;;  %p1709_p5 = scmp.lt.u32.totalorder %s1705_s3, %s2219_s2 }
  0x4b   :  { %p1711_p6 = pnand %p1709_p5, %p1706_p4 }
  0x4d   :  { %1714 = shalt.err (!%p1711_p6)
}
  0x4e   :  { %s1715_s0 = scalar_lea.vmem %s47_s21, 8192  ;;  %p1720_p8 = scmp.lt.s32.totalorder %s47_s21, %s47_s21 }
  0x4f   :  { %p1716_p7 = scmp.ne.s32.totalorder %s47_s21, %s1715_s0  ;;  %p1721_p9 = scmp.lt.s32.totalorder %s1715_s0, %s1715_s0 }
  0x51   :  { %p1722_p10 = por %p1721_p9, %p1720_p8 }
  0x53   :  { %p1723_p11 = pnand %p1722_p10, %p1716_p7 }
  0x55   :  { %1726 = shalt.err (!%p1723_p11)
}
  0x56   :  { %52 = dma.hbm_to_vmem [thread:$0]  %s2219_s2, 8192, %s47_s21, [#allocation7], %s1804_s19, %s1804_s19, %s1805_s20  }
  0x57   :  { %s1727_s13 = scalar_lea.hbm %s2222_s5, 1024 }
  0x58   :  { %p1728_p12 = scmp.ne.s32.totalorder %s2222_s5, %s1727_s13  ;;  %p1731_p13 = scmp.lt.u32.totalorder %s1727_s13, %s2222_s5 }
  0x5a   :  { %p1733_p0 = pnand %p1731_p13, %p1728_p12 }
  0x5c   :  { %1736 = shalt.err (!%p1733_p0)
}
  0x5d   :  { %s1737_s18 = scalar_lea.vmem %s1924_s23, 1024  ;;  %p1742_p2 = scmp.lt.s32.totalorder %s1924_s23, %s1924_s23 }
  0x5e   :  { %p1738_p1 = scmp.ne.s32.totalorder %s1924_s23, %s1737_s18  ;;  %p1743_p3 = scmp.lt.s32.totalorder %s1737_s18, %s1737_s18 }
  0x60   :  { %p1744_p4 = por %p1743_p3, %p1742_p2 }
  0x62   :  { %p1745_p5 = pnand %p1744_p4, %p1738_p1 }
  0x64   :  { %1748 = shalt.err (!%p1745_p5)
}
  0x65   :  { %78 = dma.hbm_to_vmem [thread:$0]  %s2222_s5, 1024, %s1924_s23, [#allocation10], %s1809_s24, %s1809_s24, %s1810_s27  }
  0x66   :  { %s1813_s20 = smov [#allocation14]   ;;  %s1749_s26 = scalar_lea.hbm %s2224_s7, 1024 }
  0x67   :  { %s96_s21 = sshll.u32 %s1813_s20, 4  ;;  %p1750_p6 = scmp.ne.s32.totalorder %s2224_s7, %s1749_s26  ;;  %s97_s21 = int_to_ptr.vmem [resolvable:$true] %s96_s21 }
  0x68   :  { %p1753_p7 = scmp.lt.u32.totalorder %s1749_s26, %s2224_s7 }
  0x6a   :  { %p1755_p8 = pnand %p1753_p7, %p1750_p6 }
  0x6c   :  { %1758 = shalt.err (!%p1755_p8)
}
  0x6d   :  { %s1759_s11 = scalar_lea.vmem %s97_s21, 1024  ;;  %p1764_p10 = scmp.lt.s32.totalorder %s97_s21, %s97_s21 }
  0x6e   :  { %p1760_p9 = scmp.ne.s32.totalorder %s97_s21, %s1759_s11  ;;  %p1765_p11 = scmp.lt.s32.totalorder %s1759_s11, %s1759_s11 }
  0x70   :  { %p1766_p12 = por %p1765_p11, %p1764_p10 }
  0x72   :  { %p1767_p13 = pnand %p1766_p12, %p1760_p9 }
  0x74   :  { %1770 = shalt.err (!%p1767_p13)
}
  0x75   :  { %102 = dma.hbm_to_vmem [thread:$0]  %s2224_s7, 1024, %s97_s21, [#allocation13], %s1809_s24, %s1809_s24, %s1810_s27  }
  0x76   :  { %1793 = dma.done.wait [#allocation4], 512  }
  0x77   :  { %1794 = vsyncadd [#allocation4], 4294966784 }
  0x78   :  { %1795 = dma.done.wait [#allocation7], 16384  }
  0x79   :  { %1796 = vsyncadd [#allocation7], 4294950912 }
  0x7a   :  { %1797 = dma.done.wait [#allocation10], 9216  }
  0x7b   :  { %1798 = vsyncadd [#allocation10], 4294958080 }
  0x7c   :  { %1799 = dma.done.wait [#allocation13], 2048  }
  0x7d   :  { %1800 = vsyncadd [#allocation13], 4294965248  ;;  %v132_v0 = vld [vmem:[#allocation6] sm:$0xff]  ;;  %v1976_v13 = vld [vmem:[#allocation6 + $0x8] sm:$0xff]  ;;  %vm1815_vm0 = vmmov 0   ;;  %s1816_s16 = smov [#allocation15]  }
  0x7e   :  { %v136_v1 = vld [vmem:[#allocation6 + $0x20] sm:$0xff]  ;;  %v197_v3 = vunpack.c.h.bf16 %v132_v0  ;;  %v196_v9 = vunpack.c.l.bf16 %v132_v0  ;;  %v1978_v14 = vld [vmem:[#allocation6 + $0x28] sm:$0xff]  ;;  %v199_v17 = vunpack.c.h.bf16 %v1976_v13  ;;  %v198_v35 = vunpack.c.l.bf16 %v1976_v13  ;;  %s1427_s12 = sshll.u32 %s1816_s16, 4  ;;  %s1428_s12 = int_to_ptr.vmem [resolvable:$true] %s1427_s12 }
  0x7f   :  { %v324_v2 = vld [vmem:[#allocation8] sm:$0xff]  ;;  %v205_v4 = vunpack.c.h.bf16 %v136_v1  ;;  %v325_v15 = vld [vmem:[#allocation8 + $0x8] sm:$0xff]  ;;  %v204_v16 = vunpack.c.l.bf16 %v136_v1  ;;  %v207_v18 = vunpack.c.h.bf16 %v1978_v14  ;;  %v206_v39 = vunpack.c.l.bf16 %v1978_v14  ;;  %p1776_p1 = scmp.lt.s32.totalorder %s1428_s12, %s1428_s12 }
  0x80   :  { %v328_v5 = vld [vmem:[#allocation8 + $0x20] sm:$0xff]  ;;  %v389_v6 = vunpack.c.h.bf16 %v324_v2  ;;  %v329_v19 = vld [vmem:[#allocation8 + $0x28] sm:$0xff]  ;;  %v391_v20 = vunpack.c.h.bf16 %v325_v15  ;;  %v388_v23 = vunpack.c.l.bf16 %v324_v2  ;;  %v390_v45 = vunpack.c.l.bf16 %v325_v15 }
  0x81   :  { %v516_v7 = vld [vmem:[#allocation9] sm:$0xff]  ;;  %v397_v10 = vunpack.c.h.bf16 %v328_v5  ;;  %v517_v21 = vld [vmem:[#allocation9 + $0x8] sm:$0xff]  ;;  %v399_v26 = vunpack.c.h.bf16 %v329_v19  ;;  %v396_v29 = vunpack.c.l.bf16 %v328_v5  ;;  %v398_v46 = vunpack.c.l.bf16 %v329_v19 }
  0x82   :  { %v520_v8 = vld [vmem:[#allocation9 + $0x20] sm:$0xff]  ;;  %v581_v11 = vunpack.c.h.bf16 %v516_v7  ;;  %v521_v22 = vld [vmem:[#allocation9 + $0x28] sm:$0xff]  ;;  %v583_v27 = vunpack.c.h.bf16 %v517_v21  ;;  %v580_v30 = vunpack.c.l.bf16 %v516_v7  ;;  %v582_v51 = vunpack.c.l.bf16 %v517_v21 }
  0x83   :  { %v589_v12 = vunpack.c.h.bf16 %v520_v8  ;;  %v591_v28 = vunpack.c.h.bf16 %v521_v22  ;;  %v588_v31 = vunpack.c.l.bf16 %v520_v8  ;;  %v1984_v40 = vld [vmem:[#allocation6 + $0x40] sm:$0xff]  ;;  %v1988_v54 = vld [vmem:[#allocation6 + $0x48] sm:$0xff]  ;;  %v590_v55 = vunpack.c.l.bf16 %v521_v22 }
  0x84   :  { %v709_v24 = vmul.f32 %v581_v11, %v389_v6  ;;  %v711_v34 = vmul.f32 %v583_v27, %v391_v20  ;;  %v708_v37 = vmul.f32 %v580_v30, %v388_v23  ;;  %v1986_v41 = vld [vmem:[#allocation6 + $0x60] sm:$0xff]  ;;  %v213_v56 = vunpack.c.h.bf16 %v1984_v40  ;;  %v1992_v59 = vld [vmem:[#allocation6 + $0x68] sm:$0xff] }
  0x85   :  { %v717_v25 = vmul.f32 %v589_v12, %v397_v10  ;;  %v719_v36 = vmul.f32 %v591_v28, %v399_v26  ;;  %v716_v38 = vmul.f32 %v588_v31, %v396_v29  ;;  %v332_v42 = vld [vmem:[#allocation8 + $0x40] sm:$0xff]  ;;  %v221_v57 = vunpack.c.h.bf16 %v1986_v41  ;;  %v333_v60 = vld [vmem:[#allocation8 + $0x48] sm:$0xff] }
  0x86   :  { %v837_v32 = vadd.f32 %v709_v24, %v197_v3  ;;  %v839_v44 = vadd.f32 %v711_v34, %v199_v17  ;;  %v336_v47 = vld [vmem:[#allocation8 + $0x60] sm:$0xff]  ;;  %v836_v49 = vadd.f32 %v708_v37, %v196_v9  ;;  %v405_v58 = vunpack.c.h.bf16 %v332_v42  ;;  %v337_v61 = vld [vmem:[#allocation8 + $0x68] sm:$0xff] }
  0x87   :  { %v845_v33 = vadd.f32 %v717_v25, %v205_v4  ;;  %v847_v48 = vadd.f32 %v719_v36, %v207_v18  ;;  %v844_v50 = vadd.f32 %v716_v38, %v204_v16  ;;  %v524_v52 = vld [vmem:[#allocation9 + $0x40] sm:$0xff]  ;;  %v710_v0 = vmul.f32 %v582_v51, %v390_v45  ;;  %v525_v2 = vld [vmem:[#allocation9 + $0x48] sm:$0xff] }
  0x88   :  { %v528_v53 = vld [vmem:[#allocation9 + $0x60] sm:$0xff]  ;;  %v413_v1 = vunpack.c.h.bf16 %v336_v47  ;;  %v718_v3 = vmul.f32 %v590_v55, %v398_v46  ;;  %v597_v4 = vunpack.c.h.bf16 %v524_v52  ;;  %v215_v6 = vunpack.c.h.bf16 %v1988_v54  ;;  %v529_v7 = vld [vmem:[#allocation9 + $0x68] sm:$0xff] }
  0x89   :  { %v970_v43 = vpack.c.bf16 %v845_v33, %v837_v32  ;;  %v972_v62 = vpack.c.bf16 %v847_v48, %v839_v44  ;;  %v969_v63 = vpack.c.bf16 %v844_v50, %v836_v49  ;;  %v605_v5 = vunpack.c.h.bf16 %v528_v53  ;;  %v1998_v28 = vld [vmem:[#allocation6 + $0x80] sm:$0xff]  ;;  %v2005_v46 = vld [vmem:[#allocation6 + $0x88] sm:$0xff] }
  0x8a   :  { %v838_v8 = vadd.f32 %v710_v0, %v198_v35  ;;  %v223_v9 = vunpack.c.h.bf16 %v1992_v59  ;;  %v407_v10 = vunpack.c.h.bf16 %v333_v60  ;;  %v415_v11 = vunpack.c.h.bf16 %v337_v61  ;;  %v2002_v33 = vld [vmem:[#allocation6 + $0xa0] sm:$0xff]  ;;  %v2008_v51 = vld [vmem:[#allocation6 + $0xa8] sm:$0xff] }
  0x8b   :  { %1061 = vmatprep.subr.bf16.mxu0 %v970_v43  ;;  %1101 = vmatprep.subr.bf16.mxu1 %v972_v62  ;;  %v846_v12 = vadd.f32 %v718_v3, %v206_v39  ;;  %v725_v13 = vmul.f32 %v597_v4, %v405_v58  ;;  %v733_v14 = vmul.f32 %v605_v5, %v413_v1  ;;  %v599_v15 = vunpack.c.h.bf16 %v525_v2  ;;  %v340_v38 = vld [vmem:[#allocation8 + $0x80] sm:$0xff]  ;;  %v533_v58 = vld [vmem:[#allocation9 + $0x88] sm:$0xff] }
  0x8c   :  { %1062 = vmatpush1.bf16.xpose.msra.mxu0 %v969_v63  ;;  %v607_v16 = vunpack.c.h.bf16 %v529_v7  ;;  %v212_v17 = vunpack.c.l.bf16 %v1984_v40  ;;  %v220_v18 = vunpack.c.l.bf16 %v1986_v41  ;;  %v404_v19 = vunpack.c.l.bf16 %v332_v42  ;;  %v344_v39 = vld [vmem:[#allocation8 + $0xa0] sm:$0xff]  ;;  %v537_v63 = vld [vmem:[#allocation9 + $0xa8] sm:$0xff] }
  0x8d   :  { %v971_v20 = vpack.c.bf16 %v846_v12, %v838_v8  ;;  %v853_v21 = vadd.f32 %v725_v13, %v213_v56  ;;  %v861_v22 = vadd.f32 %v733_v14, %v221_v57  ;;  %v727_v23 = vmul.f32 %v599_v15, %v407_v10  ;;  %v532_v44 = vld [vmem:[#allocation9 + $0x80] sm:$0xff]  ;;  %v345_v57 = vld [vmem:[#allocation8 + $0xa8] sm:$0xff] }
  0x8e   :  { %v735_v24 = vmul.f32 %v607_v16, %v415_v11  ;;  %v412_v25 = vunpack.c.l.bf16 %v336_v47  ;;  %v596_v26 = vunpack.c.l.bf16 %v524_v52  ;;  %v604_v27 = vunpack.c.l.bf16 %v528_v53  ;;  %v536_v45 = vld [vmem:[#allocation9 + $0xa0] sm:$0xff]  ;;  %v341_v52 = vld [vmem:[#allocation8 + $0x88] sm:$0xff] }
  0x8f   :  { %1102 = vmatpush1.bf16.xpose.msra.mxu1 %v971_v20  ;;  %v978_v29 = vpack.c.bf16 %v861_v22, %v853_v21  ;;  %v855_v30 = vadd.f32 %v727_v23, %v215_v6  ;;  %v214_v31 = vunpack.c.l.bf16 %v1988_v54  ;;  %v222_v32 = vunpack.c.l.bf16 %v1992_v59  ;;  %v2014_v20 = vld [vmem:[#allocation6 + $0xc0] sm:$0xff] }
  0x90   :  { %v863_v34 = vadd.f32 %v735_v24, %v223_v9  ;;  %v724_v35 = vmul.f32 %v596_v26, %v404_v19  ;;  %v732_v36 = vmul.f32 %v604_v27, %v412_v25  ;;  %v406_v37 = vunpack.c.l.bf16 %v333_v60  ;;  %v2018_v25 = vld [vmem:[#allocation6 + $0xe0] sm:$0xff] }
  0x91   :  { %1063 = vmatprep.subr.bf16.mxu0 %v978_v29  ;;  %v414_v40 = vunpack.c.l.bf16 %v337_v61  ;;  %v598_v41 = vunpack.c.l.bf16 %v525_v2  ;;  %v606_v42 = vunpack.c.l.bf16 %v529_v7  ;;  %v229_v43 = vunpack.c.h.bf16 %v1998_v28 }
  0x92   :  { %v980_v47 = vpack.c.bf16 %v863_v34, %v855_v30  ;;  %v852_v48 = vadd.f32 %v724_v35, %v212_v17  ;;  %v860_v49 = vadd.f32 %v732_v36, %v220_v18  ;;  %v237_v50 = vunpack.c.h.bf16 %v2002_v33  ;;  %v348_v30 = vld [vmem:[#allocation8 + $0xc0] sm:$0xff] }
  0x93   :  { %v726_v53 = vmul.f32 %v598_v41, %v406_v37  ;;  %v734_v54 = vmul.f32 %v606_v42, %v414_v40  ;;  %v421_v55 = vunpack.c.h.bf16 %v340_v38  ;;  %v429_v56 = vunpack.c.h.bf16 %v344_v39  ;;  %v540_v36 = vld [vmem:[#allocation9 + $0xc0] sm:$0xff] }
  0x94   :  { %1103 = vmatprep.subr.bf16.mxu1 %v980_v47  ;;  %v977_v59 = vpack.c.bf16 %v860_v49, %v852_v48  ;;  %v613_v60 = vunpack.c.h.bf16 %v532_v44  ;;  %v621_v61 = vunpack.c.h.bf16 %v536_v45  ;;  %v231_v62 = vunpack.c.h.bf16 %v2005_v46  ;;  %v544_v37 = vld [vmem:[#allocation9 + $0xe0] sm:$0xff]  ;;  %v353_v49 = vld [vmem:[#allocation8 + $0xe8] sm:$0xff] }
  0x95   :  { %v854_v0 = vadd.f32 %v726_v53, %v214_v31  ;;  %v862_v1 = vadd.f32 %v734_v54, %v222_v32  ;;  %v239_v2 = vunpack.c.h.bf16 %v2008_v51  ;;  %v423_v3 = vunpack.c.h.bf16 %v341_v52  ;;  %v352_v31 = vld [vmem:[#allocation8 + $0xe0] sm:$0xff] }
  0x96   :  { %1064 = vmatpush1.bf16.xpose.msra.mxu0 %v977_v59  ;;  %v741_v4 = vmul.f32 %v613_v60, %v421_v55  ;;  %v749_v5 = vmul.f32 %v621_v61, %v429_v56  ;;  %v431_v6 = vunpack.c.h.bf16 %v345_v57  ;;  %v615_v7 = vunpack.c.h.bf16 %v533_v58  ;;  %v545_v55 = vld [vmem:[#allocation9 + $0xe8] sm:$0xff] }
  0x97   :  { %v979_v8 = vpack.c.bf16 %v862_v1, %v854_v0  ;;  %v623_v9 = vunpack.c.h.bf16 %v537_v63  ;;  %v228_v10 = vunpack.c.l.bf16 %v1998_v28  ;;  %v236_v11 = vunpack.c.l.bf16 %v2002_v33 }
  0x98   :  { %v869_v12 = vadd.f32 %v741_v4, %v229_v43  ;;  %v877_v13 = vadd.f32 %v749_v5, %v237_v50  ;;  %v743_v14 = vmul.f32 %v615_v7, %v423_v3  ;;  %v420_v15 = vunpack.c.l.bf16 %v340_v38  ;;  %v2021_v38 = vld [vmem:[#allocation6 + $0xc8] sm:$0xff] }
  0x99   :  { %1104 = vmatpush1.bf16.xpose.msra.mxu1 %v979_v8  ;;  %v751_v16 = vmul.f32 %v623_v9, %v431_v6  ;;  %v428_v17 = vunpack.c.l.bf16 %v344_v39  ;;  %v612_v18 = vunpack.c.l.bf16 %v532_v44  ;;  %v620_v19 = vunpack.c.l.bf16 %v536_v45  ;;  %v2024_v43 = vld [vmem:[#allocation6 + $0xe8] sm:$0xff] }
  0x9a   :  { %v986_v21 = vpack.c.bf16 %v877_v13, %v869_v12  ;;  %v871_v22 = vadd.f32 %v743_v14, %v231_v62  ;;  %v230_v23 = vunpack.c.l.bf16 %v2005_v46  ;;  %v238_v24 = vunpack.c.l.bf16 %v2008_v51  ;;  %v349_v44 = vld [vmem:[#allocation8 + $0xc8] sm:$0xff]  ;;  %v2030_v12 = vld [vmem:[#allocation6 + $0x100] sm:$0xff] }
  0x9b   :  { %v879_v26 = vadd.f32 %v751_v16, %v239_v2  ;;  %v740_v27 = vmul.f32 %v612_v18, %v420_v15  ;;  %v748_v28 = vmul.f32 %v620_v19, %v428_v17  ;;  %v422_v29 = vunpack.c.l.bf16 %v341_v52  ;;  %v541_v50 = vld [vmem:[#allocation9 + $0xc8] sm:$0xff]  ;;  %v2034_v17 = vld [vmem:[#allocation6 + $0x120] sm:$0xff] }
  0x9c   :  { %1065 = vmatprep.subr.bf16.mxu0 %v986_v21  ;;  %v430_v32 = vunpack.c.l.bf16 %v345_v57  ;;  %v614_v33 = vunpack.c.l.bf16 %v533_v58  ;;  %v622_v34 = vunpack.c.l.bf16 %v537_v63  ;;  %v245_v35 = vunpack.c.h.bf16 %v2014_v20 }
  0x9d   :  { %v988_v39 = vpack.c.bf16 %v879_v26, %v871_v22  ;;  %v868_v40 = vadd.f32 %v740_v27, %v228_v10  ;;  %v876_v41 = vadd.f32 %v748_v28, %v236_v11  ;;  %v253_v42 = vunpack.c.h.bf16 %v2018_v25  ;;  %v356_v22 = vld [vmem:[#allocation8 + $0x100] sm:$0xff] }
  0x9e   :  { %v742_v45 = vmul.f32 %v614_v33, %v422_v29  ;;  %v750_v46 = vmul.f32 %v622_v34, %v430_v32  ;;  %v437_v47 = vunpack.c.h.bf16 %v348_v30  ;;  %v445_v48 = vunpack.c.h.bf16 %v352_v31  ;;  %v548_v28 = vld [vmem:[#allocation9 + $0x100] sm:$0xff] }
  0x9f   :  { %1105 = vmatprep.subr.bf16.mxu1 %v988_v39  ;;  %v985_v51 = vpack.c.bf16 %v876_v41, %v868_v40  ;;  %v629_v52 = vunpack.c.h.bf16 %v540_v36  ;;  %v637_v53 = vunpack.c.h.bf16 %v544_v37  ;;  %v247_v54 = vunpack.c.h.bf16 %v2021_v38  ;;  %v552_v29 = vld [vmem:[#allocation9 + $0x120] sm:$0xff]  ;;  %v361_v41 = vld [vmem:[#allocation8 + $0x128] sm:$0xff] }
  0xa0   :  { %v870_v56 = vadd.f32 %v742_v45, %v230_v23  ;;  %v878_v57 = vadd.f32 %v750_v46, %v238_v24  ;;  %v255_v58 = vunpack.c.h.bf16 %v2024_v43  ;;  %v439_v59 = vunpack.c.h.bf16 %v349_v44  ;;  %v360_v23 = vld [vmem:[#allocation8 + $0x120] sm:$0xff] }
  0xa1   :  { %1066 = vmatpush1.bf16.xpose.msra.mxu0 %v985_v51  ;;  %v757_v60 = vmul.f32 %v629_v52, %v437_v47  ;;  %v765_v61 = vmul.f32 %v637_v53, %v445_v48  ;;  %v447_v62 = vunpack.c.h.bf16 %v353_v49  ;;  %v631_v63 = vunpack.c.h.bf16 %v541_v50  ;;  %v553_v47 = vld [vmem:[#allocation9 + $0x128] sm:$0xff] }
  0xa2   :  { %v987_v0 = vpack.c.bf16 %v878_v57, %v870_v56  ;;  %v639_v1 = vunpack.c.h.bf16 %v545_v55  ;;  %v244_v2 = vunpack.c.l.bf16 %v2014_v20  ;;  %v252_v3 = vunpack.c.l.bf16 %v2018_v25 }
  0xa3   :  { %v885_v4 = vadd.f32 %v757_v60, %v245_v35  ;;  %v893_v5 = vadd.f32 %v765_v61, %v253_v42  ;;  %v759_v6 = vmul.f32 %v631_v63, %v439_v59  ;;  %v436_v7 = vunpack.c.l.bf16 %v348_v30  ;;  %v2037_v30 = vld [vmem:[#allocation6 + $0x108] sm:$0xff] }
  0xa4   :  { %1106 = vmatpush1.bf16.xpose.msra.mxu1 %v987_v0  ;;  %v767_v8 = vmul.f32 %v639_v1, %v447_v62  ;;  %v444_v9 = vunpack.c.l.bf16 %v352_v31  ;;  %v628_v10 = vunpack.c.l.bf16 %v540_v36  ;;  %v636_v11 = vunpack.c.l.bf16 %v544_v37  ;;  %v2040_v35 = vld [vmem:[#allocation6 + $0x128] sm:$0xff] }
  0xa5   :  { %v994_v13 = vpack.c.bf16 %v893_v5, %v885_v4  ;;  %v887_v14 = vadd.f32 %v759_v6, %v247_v54  ;;  %v246_v15 = vunpack.c.l.bf16 %v2021_v38  ;;  %v254_v16 = vunpack.c.l.bf16 %v2024_v43  ;;  %v357_v36 = vld [vmem:[#allocation8 + $0x108] sm:$0xff]  ;;  %v2046_v4 = vld [vmem:[#allocation6 + $0x140] sm:$0xff] }
  0xa6   :  { %v895_v18 = vadd.f32 %v767_v8, %v255_v58  ;;  %v756_v19 = vmul.f32 %v628_v10, %v436_v7  ;;  %v764_v20 = vmul.f32 %v636_v11, %v444_v9  ;;  %v438_v21 = vunpack.c.l.bf16 %v349_v44  ;;  %v549_v42 = vld [vmem:[#allocation9 + $0x108] sm:$0xff]  ;;  %v2050_v9 = vld [vmem:[#allocation6 + $0x160] sm:$0xff] }
  0xa7   :  { %1067 = vmatprep.subr.bf16.mxu0 %v994_v13  ;;  %v446_v24 = vunpack.c.l.bf16 %v353_v49  ;;  %v630_v25 = vunpack.c.l.bf16 %v541_v50  ;;  %v638_v26 = vunpack.c.l.bf16 %v545_v55  ;;  %v261_v27 = vunpack.c.h.bf16 %v2030_v12 }
  0xa8   :  { %v996_v31 = vpack.c.bf16 %v895_v18, %v887_v14  ;;  %v884_v32 = vadd.f32 %v756_v19, %v244_v2  ;;  %v892_v33 = vadd.f32 %v764_v20, %v252_v3  ;;  %v269_v34 = vunpack.c.h.bf16 %v2034_v17  ;;  %v364_v14 = vld [vmem:[#allocation8 + $0x140] sm:$0xff] }
  0xa9   :  { %v758_v37 = vmul.f32 %v630_v25, %v438_v21  ;;  %v766_v38 = vmul.f32 %v638_v26, %v446_v24  ;;  %v453_v39 = vunpack.c.h.bf16 %v356_v22  ;;  %v461_v40 = vunpack.c.h.bf16 %v360_v23  ;;  %v556_v20 = vld [vmem:[#allocation9 + $0x140] sm:$0xff] }
  0xaa   :  { %1107 = vmatprep.subr.bf16.mxu1 %v996_v31  ;;  %v993_v43 = vpack.c.bf16 %v892_v33, %v884_v32  ;;  %v645_v44 = vunpack.c.h.bf16 %v548_v28  ;;  %v653_v45 = vunpack.c.h.bf16 %v552_v29  ;;  %v263_v46 = vunpack.c.h.bf16 %v2037_v30  ;;  %v560_v21 = vld [vmem:[#allocation9 + $0x160] sm:$0xff]  ;;  %v369_v33 = vld [vmem:[#allocation8 + $0x168] sm:$0xff] }
  0xab   :  { %v886_v48 = vadd.f32 %v758_v37, %v246_v15  ;;  %v894_v49 = vadd.f32 %v766_v38, %v254_v16  ;;  %v271_v50 = vunpack.c.h.bf16 %v2040_v35  ;;  %v455_v51 = vunpack.c.h.bf16 %v357_v36  ;;  %v368_v15 = vld [vmem:[#allocation8 + $0x160] sm:$0xff] }
  0xac   :  { %1068 = vmatpush1.bf16.xpose.msra.mxu0 %v993_v43  ;;  %v773_v52 = vmul.f32 %v645_v44, %v453_v39  ;;  %v781_v53 = vmul.f32 %v653_v45, %v461_v40  ;;  %v463_v54 = vunpack.c.h.bf16 %v361_v41  ;;  %v647_v55 = vunpack.c.h.bf16 %v549_v42  ;;  %v561_v39 = vld [vmem:[#allocation9 + $0x168] sm:$0xff] }
  0xad   :  { %v995_v56 = vpack.c.bf16 %v894_v49, %v886_v48  ;;  %v655_v57 = vunpack.c.h.bf16 %v553_v47  ;;  %v260_v58 = vunpack.c.l.bf16 %v2030_v12  ;;  %v268_v59 = vunpack.c.l.bf16 %v2034_v17 }
  0xae   :  { %v901_v60 = vadd.f32 %v773_v52, %v261_v27  ;;  %v909_v61 = vadd.f32 %v781_v53, %v269_v34  ;;  %v775_v62 = vmul.f32 %v647_v55, %v455_v51  ;;  %v452_v63 = vunpack.c.l.bf16 %v356_v22  ;;  %v2053_v22 = vld [vmem:[#allocation6 + $0x148] sm:$0xff] }
  0xaf   :  { %1108 = vmatpush1.bf16.xpose.msra.mxu1 %v995_v56  ;;  %v783_v0 = vmul.f32 %v655_v57, %v463_v54  ;;  %v460_v1 = vunpack.c.l.bf16 %v360_v23  ;;  %v644_v2 = vunpack.c.l.bf16 %v548_v28  ;;  %v652_v3 = vunpack.c.l.bf16 %v552_v29  ;;  %v2056_v27 = vld [vmem:[#allocation6 + $0x168] sm:$0xff] }
  0xb0   :  { %v1002_v5 = vpack.c.bf16 %v909_v61, %v901_v60  ;;  %v903_v6 = vadd.f32 %v775_v62, %v263_v46  ;;  %v262_v7 = vunpack.c.l.bf16 %v2037_v30  ;;  %v270_v8 = vunpack.c.l.bf16 %v2040_v35  ;;  %v365_v28 = vld [vmem:[#allocation8 + $0x148] sm:$0xff]  ;;  %v2062_v60 = vld [vmem:[#allocation6 + $0x180] sm:$0xff] }
  0xb1   :  { %v911_v10 = vadd.f32 %v783_v0, %v271_v50  ;;  %v772_v11 = vmul.f32 %v644_v2, %v452_v63  ;;  %v780_v12 = vmul.f32 %v652_v3, %v460_v1  ;;  %v454_v13 = vunpack.c.l.bf16 %v357_v36  ;;  %v557_v34 = vld [vmem:[#allocation9 + $0x148] sm:$0xff]  ;;  %v2066_v1 = vld [vmem:[#allocation6 + $0x1a0] sm:$0xff] }
  0xb2   :  { %1069 = vmatprep.subr.bf16.mxu0 %v1002_v5  ;;  %v462_v16 = vunpack.c.l.bf16 %v361_v41  ;;  %v646_v17 = vunpack.c.l.bf16 %v549_v42  ;;  %v654_v18 = vunpack.c.l.bf16 %v553_v47  ;;  %v277_v19 = vunpack.c.h.bf16 %v2046_v4 }
  0xb3   :  { %v1004_v23 = vpack.c.bf16 %v911_v10, %v903_v6  ;;  %v900_v24 = vadd.f32 %v772_v11, %v260_v58  ;;  %v908_v25 = vadd.f32 %v780_v12, %v268_v59  ;;  %v285_v26 = vunpack.c.h.bf16 %v2050_v9  ;;  %v372_v6 = vld [vmem:[#allocation8 + $0x180] sm:$0xff] }
  0xb4   :  { %v774_v29 = vmul.f32 %v646_v17, %v454_v13  ;;  %v782_v30 = vmul.f32 %v654_v18, %v462_v16  ;;  %v469_v31 = vunpack.c.h.bf16 %v364_v14  ;;  %v477_v32 = vunpack.c.h.bf16 %v368_v15  ;;  %v564_v12 = vld [vmem:[#allocation9 + $0x180] sm:$0xff] }
  0xb5   :  { %1109 = vmatprep.subr.bf16.mxu1 %v1004_v23  ;;  %v1001_v35 = vpack.c.bf16 %v908_v25, %v900_v24  ;;  %v661_v36 = vunpack.c.h.bf16 %v556_v20  ;;  %v669_v37 = vunpack.c.h.bf16 %v560_v21  ;;  %v279_v38 = vunpack.c.h.bf16 %v2053_v22  ;;  %v568_v13 = vld [vmem:[#allocation9 + $0x1a0] sm:$0xff]  ;;  %v377_v25 = vld [vmem:[#allocation8 + $0x1a8] sm:$0xff] }
  0xb6   :  { %v902_v40 = vadd.f32 %v774_v29, %v262_v7  ;;  %v910_v41 = vadd.f32 %v782_v30, %v270_v8  ;;  %v287_v42 = vunpack.c.h.bf16 %v2056_v27  ;;  %v471_v43 = vunpack.c.h.bf16 %v365_v28  ;;  %v376_v7 = vld [vmem:[#allocation8 + $0x1a0] sm:$0xff] }
  0xb7   :  { %1070 = vmatpush1.bf16.xpose.msra.mxu0 %v1001_v35  ;;  %v789_v44 = vmul.f32 %v661_v36, %v469_v31  ;;  %v797_v45 = vmul.f32 %v669_v37, %v477_v32  ;;  %v479_v46 = vunpack.c.h.bf16 %v369_v33  ;;  %v663_v47 = vunpack.c.h.bf16 %v557_v34  ;;  %v569_v31 = vld [vmem:[#allocation9 + $0x1a8] sm:$0xff] }
  0xb8   :  { %v1003_v48 = vpack.c.bf16 %v910_v41, %v902_v40  ;;  %v671_v49 = vunpack.c.h.bf16 %v561_v39  ;;  %v276_v50 = vunpack.c.l.bf16 %v2046_v4  ;;  %v284_v51 = vunpack.c.l.bf16 %v2050_v9 }
  0xb9   :  { %v917_v52 = vadd.f32 %v789_v44, %v277_v19  ;;  %v925_v53 = vadd.f32 %v797_v45, %v285_v26  ;;  %v791_v54 = vmul.f32 %v663_v47, %v471_v43  ;;  %v468_v55 = vunpack.c.l.bf16 %v364_v14  ;;  %v2069_v14 = vld [vmem:[#allocation6 + $0x188] sm:$0xff] }
  0xba   :  { %1110 = vmatpush1.bf16.xpose.msra.mxu1 %v1003_v48  ;;  %v799_v56 = vmul.f32 %v671_v49, %v479_v46  ;;  %v476_v57 = vunpack.c.l.bf16 %v368_v15  ;;  %v660_v58 = vunpack.c.l.bf16 %v556_v20  ;;  %v668_v59 = vunpack.c.l.bf16 %v560_v21  ;;  %v2072_v19 = vld [vmem:[#allocation6 + $0x1a8] sm:$0xff] }
  0xbb   :  { %v1010_v61 = vpack.c.bf16 %v925_v53, %v917_v52  ;;  %v919_v62 = vadd.f32 %v791_v54, %v279_v38  ;;  %v278_v63 = vunpack.c.l.bf16 %v2053_v22  ;;  %v286_v0 = vunpack.c.l.bf16 %v2056_v27  ;;  %v373_v20 = vld [vmem:[#allocation8 + $0x188] sm:$0xff]  ;;  %v2078_v52 = vld [vmem:[#allocation6 + $0x1c0] sm:$0xff] }
  0xbc   :  { %v927_v2 = vadd.f32 %v799_v56, %v287_v42  ;;  %v788_v3 = vmul.f32 %v660_v58, %v468_v55  ;;  %v796_v4 = vmul.f32 %v668_v59, %v476_v57  ;;  %v470_v5 = vunpack.c.l.bf16 %v365_v28  ;;  %v565_v26 = vld [vmem:[#allocation9 + $0x188] sm:$0xff]  ;;  %v2082_v57 = vld [vmem:[#allocation6 + $0x1e0] sm:$0xff] }
  0xbd   :  { %1071 = vmatprep.subr.bf16.mxu0 %v1010_v61  ;;  %v478_v8 = vunpack.c.l.bf16 %v369_v33  ;;  %v662_v9 = vunpack.c.l.bf16 %v557_v34  ;;  %v670_v10 = vunpack.c.l.bf16 %v561_v39  ;;  %v293_v11 = vunpack.c.h.bf16 %v2062_v60 }
  0xbe   :  { %v1012_v15 = vpack.c.bf16 %v927_v2, %v919_v62  ;;  %v916_v16 = vadd.f32 %v788_v3, %v276_v50  ;;  %v924_v17 = vadd.f32 %v796_v4, %v284_v51  ;;  %v301_v18 = vunpack.c.h.bf16 %v2066_v1  ;;  %v380_v62 = vld [vmem:[#allocation8 + $0x1c0] sm:$0xff] }
  0xbf   :  { %v790_v21 = vmul.f32 %v662_v9, %v470_v5  ;;  %v798_v22 = vmul.f32 %v670_v10, %v478_v8  ;;  %v485_v23 = vunpack.c.h.bf16 %v372_v6  ;;  %v493_v24 = vunpack.c.h.bf16 %v376_v7  ;;  %v572_v4 = vld [vmem:[#allocation9 + $0x1c0] sm:$0xff] }
  0xc0   :  { %1111 = vmatprep.subr.bf16.mxu1 %v1012_v15  ;;  %v1009_v27 = vpack.c.bf16 %v924_v17, %v916_v16  ;;  %v677_v28 = vunpack.c.h.bf16 %v564_v12  ;;  %v685_v29 = vunpack.c.h.bf16 %v568_v13  ;;  %v295_v30 = vunpack.c.h.bf16 %v2069_v14  ;;  %v576_v5 = vld [vmem:[#allocation9 + $0x1e0] sm:$0xff]  ;;  %v385_v17 = vld [vmem:[#allocation8 + $0x1e8] sm:$0xff] }
  0xc1   :  { %v918_v32 = vadd.f32 %v790_v21, %v278_v63  ;;  %v926_v33 = vadd.f32 %v798_v22, %v286_v0  ;;  %v303_v34 = vunpack.c.h.bf16 %v2072_v19  ;;  %v487_v35 = vunpack.c.h.bf16 %v373_v20  ;;  %v384_v63 = vld [vmem:[#allocation8 + $0x1e0] sm:$0xff] }
  0xc2   :  { %1072 = vmatpush1.bf16.xpose.msra.mxu0 %v1009_v27  ;;  %v805_v36 = vmul.f32 %v677_v28, %v485_v23  ;;  %v813_v37 = vmul.f32 %v685_v29, %v493_v24  ;;  %v495_v38 = vunpack.c.h.bf16 %v377_v25  ;;  %v679_v39 = vunpack.c.h.bf16 %v565_v26  ;;  %v577_v23 = vld [vmem:[#allocation9 + $0x1e8] sm:$0xff] }
  0xc3   :  { %v1011_v40 = vpack.c.bf16 %v926_v33, %v918_v32  ;;  %v687_v41 = vunpack.c.h.bf16 %v569_v31  ;;  %v292_v42 = vunpack.c.l.bf16 %v2062_v60  ;;  %v300_v43 = vunpack.c.l.bf16 %v2066_v1 }
  0xc4   :  { %v933_v44 = vadd.f32 %v805_v36, %v293_v11  ;;  %v941_v45 = vadd.f32 %v813_v37, %v301_v18  ;;  %v807_v46 = vmul.f32 %v679_v39, %v487_v35  ;;  %v484_v47 = vunpack.c.l.bf16 %v372_v6  ;;  %v2085_v6 = vld [vmem:[#allocation6 + $0x1c8] sm:$0xff] }
  0xc5   :  { %1112 = vmatpush1.bf16.xpose.msra.mxu1 %v1011_v40  ;;  %v815_v48 = vmul.f32 %v687_v41, %v495_v38  ;;  %v492_v49 = vunpack.c.l.bf16 %v376_v7  ;;  %v676_v50 = vunpack.c.l.bf16 %v564_v12  ;;  %v684_v51 = vunpack.c.l.bf16 %v568_v13  ;;  %v2088_v11 = vld [vmem:[#allocation6 + $0x1e8] sm:$0xff] }
  0xc6   :  { %v1018_v53 = vpack.c.bf16 %v941_v45, %v933_v44  ;;  %v935_v54 = vadd.f32 %v807_v46, %v295_v30  ;;  %v294_v55 = vunpack.c.l.bf16 %v2069_v14  ;;  %v302_v56 = vunpack.c.l.bf16 %v2072_v19  ;;  %v381_v12 = vld [vmem:[#allocation8 + $0x1c8] sm:$0xff]  ;;  %v2094_v44 = vld [vmem:[#allocation3] sm:$0xff] }
  0xc7   :  { %v943_v58 = vadd.f32 %v815_v48, %v303_v34  ;;  %v804_v59 = vmul.f32 %v676_v50, %v484_v47  ;;  %v812_v60 = vmul.f32 %v684_v51, %v492_v49  ;;  %v486_v61 = vunpack.c.l.bf16 %v373_v20  ;;  %v573_v18 = vld [vmem:[#allocation9 + $0x1c8] sm:$0xff] }
  0xc8   :  { %1073 = vmatprep.subr.bf16.mxu0 %v1018_v53  ;;  %v494_v0 = vunpack.c.l.bf16 %v377_v25  ;;  %v678_v1 = vunpack.c.l.bf16 %v565_v26  ;;  %v686_v2 = vunpack.c.l.bf16 %v569_v31  ;;  %v309_v3 = vunpack.c.h.bf16 %v2078_v52  ;;  %v2098_v53 = vld [vmem:[#allocation3 + $0x8] sm:$0xff] }
  0xc9   :  { %v1020_v7 = vpack.c.bf16 %v943_v58, %v935_v54  ;;  %v932_v8 = vadd.f32 %v804_v59, %v292_v42  ;;  %v940_v9 = vadd.f32 %v812_v60, %v300_v43  ;;  %v317_v10 = vunpack.c.h.bf16 %v2082_v57  ;;  %v2102_v58 = vld [vmem:[#allocation6 + $0x10] sm:$0xff] }
  0xca   :  { %v806_v13 = vmul.f32 %v678_v1, %v486_v61  ;;  %v814_v14 = vmul.f32 %v686_v2, %v494_v0  ;;  %v501_v15 = vunpack.c.h.bf16 %v380_v62  ;;  %v509_v16 = vunpack.c.h.bf16 %v384_v63  ;;  %v2104_v59 = vld [vmem:[#allocation6 + $0x30] sm:$0xff] }
  0xcb   :  { %1113 = vmatprep.subr.bf16.mxu1 %v1020_v7  ;;  %v1017_v19 = vpack.c.bf16 %v940_v9, %v932_v8  ;;  %v693_v20 = vunpack.c.h.bf16 %v572_v4  ;;  %v701_v21 = vunpack.c.h.bf16 %v576_v5  ;;  %v311_v22 = vunpack.c.h.bf16 %v2085_v6  ;;  %v326_v0 = vld [vmem:[#allocation8 + $0x10] sm:$0xff] }
  0xcc   :  { %v934_v24 = vadd.f32 %v806_v13, %v294_v55  ;;  %v942_v25 = vadd.f32 %v814_v14, %v302_v56  ;;  %v319_v26 = vunpack.c.h.bf16 %v2088_v11  ;;  %v503_v27 = vunpack.c.h.bf16 %v381_v12 }
  0xcd   :  { %1074 = vmatpush1.bf16.xpose.msra.mxu0 %v1017_v19  ;;  %v821_v28 = vmul.f32 %v693_v20, %v501_v15  ;;  %v829_v29 = vmul.f32 %v701_v21, %v509_v16  ;;  %v511_v30 = vunpack.c.h.bf16 %v385_v17  ;;  %v695_v31 = vunpack.c.h.bf16 %v573_v18  ;;  %v135_v16 = vld [vmem:[#allocation6 + $0x18] sm:$0xff] }
  0xce   :  { %v1019_v32 = vpack.c.bf16 %v942_v25, %v934_v24  ;;  %v703_v33 = vunpack.c.h.bf16 %v577_v23  ;;  %v308_v34 = vunpack.c.l.bf16 %v2078_v52  ;;  %v316_v35 = vunpack.c.l.bf16 %v2082_v57 }
  0xcf   :  { %v949_v36 = vadd.f32 %v821_v28, %v309_v3  ;;  %v957_v37 = vadd.f32 %v829_v29, %v317_v10  ;;  %v823_v38 = vmul.f32 %v695_v31, %v503_v27  ;;  %v500_v39 = vunpack.c.l.bf16 %v380_v62  ;;  %v331_v27 = vld [vmem:[#allocation8 + $0x38] sm:$0xff] }
  0xd0   :  { %1114 = vmatpush1.bf16.xpose.msra.mxu1 %v1019_v32  ;;  %v831_v40 = vmul.f32 %v703_v33, %v511_v30  ;;  %v508_v41 = vunpack.c.l.bf16 %v384_v63  ;;  %v692_v42 = vunpack.c.l.bf16 %v572_v4  ;;  %v700_v43 = vunpack.c.l.bf16 %v576_v5  ;;  %v330_v5 = vld [vmem:[#allocation8 + $0x30] sm:$0xff]  ;;  %v519_v28 = vld [vmem:[#allocation9 + $0x18] sm:$0xff] }
  0xd1   :  { %v1026_v45 = vpack.c.bf16 %v957_v37, %v949_v36  ;;  %v951_v46 = vadd.f32 %v823_v38, %v311_v22  ;;  %v310_v47 = vunpack.c.l.bf16 %v2085_v6  ;;  %v318_v48 = vunpack.c.l.bf16 %v2088_v11  ;;  %v518_v6 = vld [vmem:[#allocation9 + $0x10] sm:$0xff]  ;;  %v327_v22 = vld [vmem:[#allocation8 + $0x18] sm:$0xff] }
  0xd2   :  { %v959_v49 = vadd.f32 %v831_v40, %v319_v26  ;;  %v820_v50 = vmul.f32 %v692_v42, %v500_v39  ;;  %v828_v51 = vmul.f32 %v700_v43, %v508_v41  ;;  %v502_v52 = vunpack.c.l.bf16 %v381_v12  ;;  %v522_v11 = vld [vmem:[#allocation9 + $0x30] sm:$0xff]  ;;  %v523_v33 = vld [vmem:[#allocation9 + $0x38] sm:$0xff] }
  0xd3   :  { %1075 = vmatprep.subr.bf16.mxu0 %v1026_v45  ;;  %v510_v54 = vunpack.c.l.bf16 %v385_v17  ;;  %v694_v55 = vunpack.c.l.bf16 %v573_v18  ;;  %v702_v56 = vunpack.c.l.bf16 %v577_v23  ;;  %v1439_v57 = vcombine.low %v2094_v44, %v2094_v44  ;;  %v139_v17 = vld [vmem:[#allocation6 + $0x38] sm:$0xff]  ;;  %v2116_v42 = vld [vmem:[#allocation6 + $0x50] sm:$0xff] }
  0xd4   :  { %v1028_v60 = vpack.c.bf16 %v959_v49, %v951_v46  ;;  %v948_v61 = vadd.f32 %v820_v50, %v308_v34  ;;  %v956_v62 = vadd.f32 %v828_v51, %v316_v35  ;;  %v1440_v63 = vcombine.high %v2094_v44, %v2094_v44  ;;  %v526_v44 = vld [vmem:[#allocation9 + $0x50] sm:$0xff] }
  0xd5   :  { %v822_v1 = vmul.f32 %v694_v55, %v502_v52  ;;  %v830_v2 = vmul.f32 %v702_v56, %v510_v54  ;;  %v1441_v3 = vcombine.low %v2098_v53, %v2098_v53  ;;  %v1442_v4 = vcombine.high %v2098_v53, %v2098_v53  ;;  %v2118_v52 = vld [vmem:[#allocation6 + $0x70] sm:$0xff]  ;;  %v527_v53 = vld [vmem:[#allocation9 + $0x58] sm:$0xff] }
  0xd6   :  { %1115 = vmatprep.subr.bf16.mxu1 %v1028_v60  ;;  %v1025_v7 = vpack.c.bf16 %v956_v62, %v948_v61  ;;  %1093 = vmatprep.mubr.bf16.mxu0 %v1440_v63  ;;  %v200_v8 = vunpack.c.l.bf16 %v2102_v58  ;;  %v201_v9 = vunpack.c.h.bf16 %v2102_v58  ;;  %v208_v10 = vunpack.c.l.bf16 %v2104_v59 }
  0xd7   :  { %v950_v12 = vadd.f32 %v822_v1, %v310_v47  ;;  %v958_v13 = vadd.f32 %v830_v2, %v318_v48  ;;  %1133 = vmatprep.mubr.bf16.mxu1 %v1442_v4  ;;  %v209_v14 = vunpack.c.h.bf16 %v2104_v59  ;;  %v392_v15 = vunpack.c.l.bf16 %v326_v0  ;;  %v334_v59 = vld [vmem:[#allocation8 + $0x50] sm:$0xff] }
  0xd8   :  { %1076 = vmatpush1.bf16.xpose.msra.mxu0 %v1025_v7  ;;  %v393_v18 = vunpack.c.h.bf16 %v326_v0  ;;  %v400_v19 = vunpack.c.l.bf16 %v330_v5  ;;  %v401_v20 = vunpack.c.h.bf16 %v330_v5  ;;  %v584_v21 = vunpack.c.l.bf16 %v518_v6  ;;  %v338_v0 = vld [vmem:[#allocation8 + $0x70] sm:$0xff] }
  0xd9   :  { %v1027_v23 = vpack.c.bf16 %v958_v13, %v950_v12  ;;  %v585_v24 = vunpack.c.h.bf16 %v518_v6  ;;  %v592_v25 = vunpack.c.l.bf16 %v522_v11  ;;  %v593_v26 = vunpack.c.h.bf16 %v522_v11  ;;  %v147_v11 = vld [vmem:[#allocation6 + $0x78] sm:$0xff] }
  0xda   :  { %v202_v29 = vunpack.c.l.bf16 %v135_v16  ;;  %v203_v30 = vunpack.c.h.bf16 %v135_v16  ;;  %v210_v31 = vunpack.c.l.bf16 %v139_v17  ;;  %v211_v32 = vunpack.c.h.bf16 %v139_v17  ;;  %v335_v16 = vld [vmem:[#allocation8 + $0x58] sm:$0xff] }
  0xdb   :  { %1116 = vmatpush1.bf16.xpose.msra.mxu1 %v1027_v23  ;;  %v713_v34 = vmul.f32 %v585_v24, %v393_v18  ;;  %v721_v35 = vmul.f32 %v593_v26, %v401_v20  ;;  %v394_v36 = vunpack.c.l.bf16 %v327_v22  ;;  %v395_v37 = vunpack.c.h.bf16 %v327_v22 }
  0xdc   :  { %v402_v38 = vunpack.c.l.bf16 %v331_v27  ;;  %v403_v39 = vunpack.c.h.bf16 %v331_v27  ;;  %v586_v40 = vunpack.c.l.bf16 %v519_v28  ;;  %v587_v41 = vunpack.c.h.bf16 %v519_v28 }
  0xdd   :  { %v841_v43 = vadd.f32 %v713_v34, %v201_v9  ;;  %v849_v45 = vadd.f32 %v721_v35, %v209_v14  ;;  %v594_v46 = vunpack.c.l.bf16 %v523_v33  ;;  %v595_v47 = vunpack.c.h.bf16 %v523_v33  ;;  %v2130_v34 = vld [vmem:[#allocation6 + $0x90] sm:$0xff] }
  0xde   :  { %v715_v48 = vmul.f32 %v587_v41, %v395_v37  ;;  %v712_v49 = vmul.f32 %v584_v21, %v392_v15  ;;  %v720_v50 = vmul.f32 %v592_v25, %v400_v19  ;;  %v714_v51 = vmul.f32 %v586_v40, %v394_v36  ;;  %v339_v21 = vld [vmem:[#allocation8 + $0x78] sm:$0xff] }
  0xdf   :  { %1094 = vmatmul.mubr.bf16.vlgmr.msra.gmra.mrb[0].mxu0 %v1439_v57  ;;  %v974_v54 = vpack.c.bf16 %v849_v45, %v841_v43  ;;  %v723_v55 = vmul.f32 %v595_v47, %v403_v39  ;;  %v722_v56 = vmul.f32 %v594_v46, %v402_v38  ;;  %v216_v58 = vunpack.c.l.bf16 %v2116_v42  ;;  %v530_v57 = vld [vmem:[#allocation9 + $0x70] sm:$0xff]  ;;  %v531_v25 = vld [vmem:[#allocation9 + $0x78] sm:$0xff] }
  0xe0   :  { %v843_v60 = vadd.f32 %v715_v48, %v203_v30  ;;  %v840_v61 = vadd.f32 %v712_v49, %v200_v8  ;;  %v848_v62 = vadd.f32 %v720_v50, %v208_v10  ;;  %v842_v63 = vadd.f32 %v714_v51, %v202_v29  ;;  %v143_v10 = vld [vmem:[#allocation6 + $0x58] sm:$0xff]  ;;  %v2132_v45 = vld [vmem:[#allocation6 + $0xb0] sm:$0xff] }
  0xe1   :  { %1141 = vmatprep.subr.bf16.mxu0 %v974_v54  ;;  %v851_v1 = vadd.f32 %v723_v55, %v211_v32  ;;  %v850_v2 = vadd.f32 %v722_v56, %v210_v31  ;;  %v217_v4 = vunpack.c.h.bf16 %v2116_v42  ;;  %v224_v5 = vunpack.c.l.bf16 %v2118_v52  ;;  %v342_v50 = vld [vmem:[#allocation8 + $0x90] sm:$0xff]  ;;  %v155_v42 = vld [vmem:[#allocation6 + $0xb8] sm:$0xff] }
  0xe2   :  { %1134 = vmatmul.mubr.bf16.vlgmr.msra.gmra.mrb[0].mxu1 %v1441_v3  ;;  %v973_v6 = vpack.c.bf16 %v848_v62, %v840_v61  ;;  %v225_v7 = vunpack.c.h.bf16 %v2118_v52  ;;  %v408_v8 = vunpack.c.l.bf16 %v334_v59  ;;  %v409_v9 = vunpack.c.h.bf16 %v334_v59  ;;  %v346_v56 = vld [vmem:[#allocation8 + $0xb0] sm:$0xff] }
  0xe3   :  { %v976_v12 = vpack.c.bf16 %v851_v1, %v843_v60  ;;  %v975_v13 = vpack.c.bf16 %v850_v2, %v842_v63  ;;  %v416_v14 = vunpack.c.l.bf16 %v338_v0  ;;  %v417_v15 = vunpack.c.h.bf16 %v338_v0  ;;  %v534_v63 = vld [vmem:[#allocation9 + $0x90] sm:$0xff] }
  0xe4   :  { %1142 = vmatpush1.bf16.xpose.msra.mxu0 %v973_v6  ;;  %v600_v17 = vunpack.c.l.bf16 %v526_v44  ;;  %v601_v18 = vunpack.c.h.bf16 %v526_v44  ;;  %v608_v19 = vunpack.c.l.bf16 %v530_v57  ;;  %v609_v20 = vunpack.c.h.bf16 %v530_v57  ;;  %v538_v0 = vld [vmem:[#allocation9 + $0xb0] sm:$0xff]  ;;  %v151_v57 = vld [vmem:[#allocation6 + $0x98] sm:$0xff] }
  0xe5   :  { %1181 = vmatprep.subr.bf16.mxu1 %v976_v12  ;;  %v218_v3 = vunpack.c.l.bf16 %v143_v10  ;;  %v219_v22 = vunpack.c.h.bf16 %v143_v10  ;;  %v226_v23 = vunpack.c.l.bf16 %v147_v11  ;;  %v227_v24 = vunpack.c.h.bf16 %v147_v11 }
  0xe6   :  { %1182 = vmatpush1.bf16.xpose.msra.mxu1 %v975_v13  ;;  %v729_v26 = vmul.f32 %v601_v18, %v409_v9  ;;  %v737_v27 = vmul.f32 %v609_v20, %v417_v15  ;;  %v410_v28 = vunpack.c.l.bf16 %v335_v16  ;;  %v411_v29 = vunpack.c.h.bf16 %v335_v16  ;;  %v347_v13 = vld [vmem:[#allocation8 + $0xb8] sm:$0xff] }
  0xe7   :  { %v418_v30 = vunpack.c.l.bf16 %v339_v21  ;;  %v419_v31 = vunpack.c.h.bf16 %v339_v21  ;;  %v602_v32 = vunpack.c.l.bf16 %v527_v53  ;;  %v603_v33 = vunpack.c.h.bf16 %v527_v53 }
  0xe8   :  { %v857_v35 = vadd.f32 %v729_v26, %v217_v4  ;;  %v865_v36 = vadd.f32 %v737_v27, %v225_v7  ;;  %v610_v37 = vunpack.c.l.bf16 %v531_v25  ;;  %v611_v38 = vunpack.c.h.bf16 %v531_v25  ;;  %v2140_v26 = vld [vmem:[#allocation6 + $0xd0] sm:$0xff] }
  0xe9   :  { %v731_v39 = vmul.f32 %v603_v33, %v411_v29  ;;  %v728_v40 = vmul.f32 %v600_v17, %v408_v8  ;;  %v736_v41 = vmul.f32 %v608_v19, %v416_v14  ;;  %v730_v43 = vmul.f32 %v602_v32, %v410_v28  ;;  %v343_v8 = vld [vmem:[#allocation8 + $0x98] sm:$0xff] }
  0xea   :  { %v982_v46 = vpack.c.bf16 %v865_v36, %v857_v35  ;;  %v739_v47 = vmul.f32 %v611_v38, %v419_v31  ;;  %v738_v48 = vmul.f32 %v610_v37, %v418_v30  ;;  %v232_v49 = vunpack.c.l.bf16 %v2130_v34  ;;  %v535_v14 = vld [vmem:[#allocation9 + $0x98] sm:$0xff]  ;;  %v2142_v36 = vld [vmem:[#allocation6 + $0xf0] sm:$0xff] }
  0xeb   :  { %v859_v51 = vadd.f32 %v731_v39, %v219_v22  ;;  %v856_v52 = vadd.f32 %v728_v40, %v216_v58  ;;  %v864_v54 = vadd.f32 %v736_v41, %v224_v5  ;;  %v858_v55 = vadd.f32 %v730_v43, %v218_v3  ;;  %v539_v19 = vld [vmem:[#allocation9 + $0xb8] sm:$0xff]  ;;  %v350_v41 = vld [vmem:[#allocation8 + $0xd0] sm:$0xff] }
  0xec   :  { %1143 = vmatprep.subr.bf16.mxu0 %v982_v46  ;;  %v867_v59 = vadd.f32 %v739_v47, %v227_v24  ;;  %v866_v60 = vadd.f32 %v738_v48, %v226_v23  ;;  %v233_v61 = vunpack.c.h.bf16 %v2130_v34  ;;  %v240_v62 = vunpack.c.l.bf16 %v2132_v45  ;;  %v354_v48 = vld [vmem:[#allocation8 + $0xf0] sm:$0xff]  ;;  %v163_v34 = vld [vmem:[#allocation6 + $0xf8] sm:$0xff] }
  0xed   :  { %v981_v1 = vpack.c.bf16 %v864_v54, %v856_v52  ;;  %v241_v2 = vunpack.c.h.bf16 %v2132_v45  ;;  %v424_v4 = vunpack.c.l.bf16 %v342_v50  ;;  %v425_v44 = vunpack.c.h.bf16 %v342_v50 }
  0xee   :  { %v984_v58 = vpack.c.bf16 %v867_v59, %v859_v51  ;;  %v983_v5 = vpack.c.bf16 %v866_v60, %v858_v55  ;;  %v432_v6 = vunpack.c.l.bf16 %v346_v56  ;;  %v433_v7 = vunpack.c.h.bf16 %v346_v56  ;;  %v542_v55 = vld [vmem:[#allocation9 + $0xd0] sm:$0xff] }
  0xef   :  { %1144 = vmatpush1.bf16.xpose.msra.mxu0 %v981_v1  ;;  %v616_v9 = vunpack.c.l.bf16 %v534_v63  ;;  %v617_v10 = vunpack.c.h.bf16 %v534_v63  ;;  %v624_v11 = vunpack.c.l.bf16 %v538_v0  ;;  %v625_v12 = vunpack.c.h.bf16 %v538_v0  ;;  %v546_v56 = vld [vmem:[#allocation9 + $0xf0] sm:$0xff]  ;;  %v159_v0 = vld [vmem:[#allocation6 + $0xd8] sm:$0xff] }
  0xf0   :  { %1183 = vmatprep.subr.bf16.mxu1 %v984_v58  ;;  %v234_v15 = vunpack.c.l.bf16 %v151_v57  ;;  %v235_v16 = vunpack.c.h.bf16 %v151_v57  ;;  %v242_v17 = vunpack.c.l.bf16 %v155_v42  ;;  %v243_v18 = vunpack.c.h.bf16 %v155_v42 }
  0xf1   :  { %1184 = vmatpush1.bf16.xpose.msra.mxu1 %v983_v5  ;;  %v745_v20 = vmul.f32 %v617_v10, %v425_v44  ;;  %v753_v21 = vmul.f32 %v625_v12, %v433_v7  ;;  %v426_v53 = vunpack.c.l.bf16 %v343_v8  ;;  %v427_v3 = vunpack.c.h.bf16 %v343_v8  ;;  %v355_v5 = vld [vmem:[#allocation8 + $0xf8] sm:$0xff] }
  0xf2   :  { %v434_v22 = vunpack.c.l.bf16 %v347_v13  ;;  %v435_v23 = vunpack.c.h.bf16 %v347_v13  ;;  %v618_v24 = vunpack.c.l.bf16 %v535_v14  ;;  %v619_v25 = vunpack.c.h.bf16 %v535_v14 }
  0xf3   :  { %v873_v27 = vadd.f32 %v745_v20, %v233_v61  ;;  %v881_v28 = vadd.f32 %v753_v21, %v241_v2  ;;  %v626_v29 = vunpack.c.l.bf16 %v539_v19  ;;  %v627_v30 = vunpack.c.h.bf16 %v539_v19  ;;  %v2150_v20 = vld [vmem:[#allocation6 + $0x110] sm:$0xff] }
  0xf4   :  { %v747_v31 = vmul.f32 %v619_v25, %v427_v3  ;;  %v744_v32 = vmul.f32 %v616_v9, %v424_v4  ;;  %v752_v33 = vmul.f32 %v624_v11, %v432_v6  ;;  %v746_v35 = vmul.f32 %v618_v24, %v426_v53  ;;  %v351_v4 = vld [vmem:[#allocation8 + $0xd8] sm:$0xff] }
  0xf5   :  { %v990_v37 = vpack.c.bf16 %v881_v28, %v873_v27  ;;  %v755_v38 = vmul.f32 %v627_v30, %v435_v23  ;;  %v754_v39 = vmul.f32 %v626_v29, %v434_v22  ;;  %v248_v40 = vunpack.c.l.bf16 %v2140_v26  ;;  %v543_v6 = vld [vmem:[#allocation9 + $0xd8] sm:$0xff]  ;;  %v2152_v28 = vld [vmem:[#allocation6 + $0x130] sm:$0xff] }
  0xf6   :  { %v875_v43 = vadd.f32 %v747_v31, %v235_v16  ;;  %v872_v45 = vadd.f32 %v744_v32, %v232_v49  ;;  %v880_v46 = vadd.f32 %v752_v33, %v240_v62  ;;  %v874_v47 = vadd.f32 %v746_v35, %v234_v15  ;;  %v547_v11 = vld [vmem:[#allocation9 + $0xf8] sm:$0xff]  ;;  %v358_v33 = vld [vmem:[#allocation8 + $0x110] sm:$0xff] }
  0xf7   :  { %1145 = vmatprep.subr.bf16.mxu0 %v990_v37  ;;  %v883_v50 = vadd.f32 %v755_v38, %v243_v18  ;;  %v882_v51 = vadd.f32 %v754_v39, %v242_v17  ;;  %v249_v52 = vunpack.c.h.bf16 %v2140_v26  ;;  %v256_v54 = vunpack.c.l.bf16 %v2142_v36  ;;  %v362_v39 = vld [vmem:[#allocation8 + $0x130] sm:$0xff]  ;;  %v171_v26 = vld [vmem:[#allocation6 + $0x138] sm:$0xff] }
  0xf8   :  { %v989_v59 = vpack.c.bf16 %v880_v46, %v872_v45  ;;  %v257_v60 = vunpack.c.h.bf16 %v2142_v36  ;;  %v440_v61 = vunpack.c.l.bf16 %v350_v41  ;;  %v441_v63 = vunpack.c.h.bf16 %v350_v41 }
  0xf9   :  { %v992_v49 = vpack.c.bf16 %v883_v50, %v875_v43  ;;  %v991_v62 = vpack.c.bf16 %v882_v51, %v874_v47  ;;  %v448_v1 = vunpack.c.l.bf16 %v354_v48  ;;  %v449_v2 = vunpack.c.h.bf16 %v354_v48  ;;  %v550_v47 = vld [vmem:[#allocation9 + $0x110] sm:$0xff] }
  0xfa   :  { %1146 = vmatpush1.bf16.xpose.msra.mxu0 %v989_v59  ;;  %v632_v44 = vunpack.c.l.bf16 %v542_v55  ;;  %v633_v57 = vunpack.c.h.bf16 %v542_v55  ;;  %v640_v42 = vunpack.c.l.bf16 %v546_v56  ;;  %v641_v58 = vunpack.c.h.bf16 %v546_v56  ;;  %v554_v48 = vld [vmem:[#allocation9 + $0x130] sm:$0xff]  ;;  %v167_v56 = vld [vmem:[#allocation6 + $0x118] sm:$0xff] }
  0xfb   :  { %1185 = vmatprep.subr.bf16.mxu1 %v992_v49  ;;  %v250_v7 = vunpack.c.l.bf16 %v159_v0  ;;  %v251_v8 = vunpack.c.h.bf16 %v159_v0  ;;  %v258_v9 = vunpack.c.l.bf16 %v163_v34  ;;  %v259_v10 = vunpack.c.h.bf16 %v163_v34 }
  0xfc   :  { %1186 = vmatpush1.bf16.xpose.msra.mxu1 %v991_v62  ;;  %v761_v12 = vmul.f32 %v633_v57, %v441_v63  ;;  %v769_v13 = vmul.f32 %v641_v58, %v449_v2  ;;  %v442_v14 = vunpack.c.l.bf16 %v351_v4  ;;  %v443_v15 = vunpack.c.h.bf16 %v351_v4  ;;  %v363_v62 = vld [vmem:[#allocation8 + $0x138] sm:$0xff] }
  0xfd   :  { %v450_v16 = vunpack.c.l.bf16 %v355_v5  ;;  %v451_v17 = vunpack.c.h.bf16 %v355_v5  ;;  %v634_v18 = vunpack.c.l.bf16 %v543_v6  ;;  %v635_v19 = vunpack.c.h.bf16 %v543_v6 }
  0xfe   :  { %v889_v21 = vadd.f32 %v761_v12, %v249_v52  ;;  %v897_v53 = vadd.f32 %v769_v13, %v257_v60  ;;  %v642_v3 = vunpack.c.l.bf16 %v547_v11  ;;  %v643_v22 = vunpack.c.h.bf16 %v547_v11  ;;  %v2160_v12 = vld [vmem:[#allocation6 + $0x150] sm:$0xff] }
  0xff   :  { %v763_v23 = vmul.f32 %v635_v19, %v443_v15  ;;  %v760_v24 = vmul.f32 %v632_v44, %v440_v61  ;;  %v768_v25 = vmul.f32 %v640_v42, %v448_v1  ;;  %v762_v27 = vmul.f32 %v634_v18, %v442_v14  ;;  %v359_v61 = vld [vmem:[#allocation8 + $0x118] sm:$0xff] }
 0x100   :  { %v998_v29 = vpack.c.bf16 %v897_v53, %v889_v21  ;;  %v771_v30 = vmul.f32 %v643_v22, %v451_v17  ;;  %v770_v31 = vmul.f32 %v642_v3, %v450_v16  ;;  %v264_v32 = vunpack.c.l.bf16 %v2150_v20  ;;  %v551_v1 = vld [vmem:[#allocation9 + $0x118] sm:$0xff]  ;;  %v2162_v53 = vld [vmem:[#allocation6 + $0x170] sm:$0xff] }
 0x101   :  { %v891_v35 = vadd.f32 %v763_v23, %v251_v8  ;;  %v888_v36 = vadd.f32 %v760_v24, %v248_v40  ;;  %v896_v37 = vadd.f32 %v768_v25, %v256_v54  ;;  %v890_v38 = vadd.f32 %v762_v27, %v250_v7  ;;  %v555_v42 = vld [vmem:[#allocation9 + $0x138] sm:$0xff]  ;;  %v366_v25 = vld [vmem:[#allocation8 + $0x150] sm:$0xff] }
 0x102   :  { %1147 = vmatprep.subr.bf16.mxu0 %v998_v29  ;;  %v899_v41 = vadd.f32 %v771_v30, %v259_v10  ;;  %v898_v43 = vadd.f32 %v770_v31, %v258_v9  ;;  %v265_v45 = vunpack.c.h.bf16 %v2150_v20  ;;  %v272_v46 = vunpack.c.l.bf16 %v2152_v28  ;;  %v370_v31 = vld [vmem:[#allocation8 + $0x170] sm:$0xff]  ;;  %v179_v20 = vld [vmem:[#allocation6 + $0x178] sm:$0xff] }
 0x103   :  { %v997_v50 = vpack.c.bf16 %v896_v37, %v888_v36  ;;  %v273_v51 = vunpack.c.h.bf16 %v2152_v28  ;;  %v456_v52 = vunpack.c.l.bf16 %v358_v33  ;;  %v457_v55 = vunpack.c.h.bf16 %v358_v33 }
 0x104   :  { %v1000_v40 = vpack.c.bf16 %v899_v41, %v891_v35  ;;  %v999_v54 = vpack.c.bf16 %v898_v43, %v890_v38  ;;  %v464_v59 = vunpack.c.l.bf16 %v362_v39  ;;  %v465_v60 = vunpack.c.h.bf16 %v362_v39  ;;  %v558_v38 = vld [vmem:[#allocation9 + $0x150] sm:$0xff] }
 0x105   :  { %1148 = vmatpush1.bf16.xpose.msra.mxu0 %v997_v50  ;;  %v648_v63 = vunpack.c.l.bf16 %v550_v47  ;;  %v649_v0 = vunpack.c.h.bf16 %v550_v47  ;;  %v656_v34 = vunpack.c.l.bf16 %v554_v48  ;;  %v657_v49 = vunpack.c.h.bf16 %v554_v48  ;;  %v562_v39 = vld [vmem:[#allocation9 + $0x170] sm:$0xff]  ;;  %v175_v48 = vld [vmem:[#allocation6 + $0x158] sm:$0xff] }
 0x106   :  { %1187 = vmatprep.subr.bf16.mxu1 %v1000_v40  ;;  %v266_v2 = vunpack.c.l.bf16 %v167_v56  ;;  %v267_v4 = vunpack.c.h.bf16 %v167_v56  ;;  %v274_v44 = vunpack.c.l.bf16 %v171_v26  ;;  %v275_v57 = vunpack.c.h.bf16 %v171_v26 }
 0x107   :  { %1188 = vmatpush1.bf16.xpose.msra.mxu1 %v999_v54  ;;  %v777_v58 = vmul.f32 %v649_v0, %v457_v55  ;;  %v785_v5 = vmul.f32 %v657_v49, %v465_v60  ;;  %v458_v6 = vunpack.c.l.bf16 %v359_v61  ;;  %v459_v7 = vunpack.c.h.bf16 %v359_v61  ;;  %v371_v54 = vld [vmem:[#allocation8 + $0x178] sm:$0xff] }
 0x108   :  { %v466_v8 = vunpack.c.l.bf16 %v363_v62  ;;  %v467_v9 = vunpack.c.h.bf16 %v363_v62  ;;  %v650_v10 = vunpack.c.l.bf16 %v551_v1  ;;  %v651_v11 = vunpack.c.h.bf16 %v551_v1 }
 0x109   :  { %v905_v13 = vadd.f32 %v777_v58, %v265_v45  ;;  %v913_v14 = vadd.f32 %v785_v5, %v273_v51  ;;  %v658_v15 = vunpack.c.l.bf16 %v555_v42  ;;  %v659_v16 = vunpack.c.h.bf16 %v555_v42  ;;  %v2170_v58 = vld [vmem:[#allocation6 + $0x190] sm:$0xff] }
 0x10a   :  { %v779_v17 = vmul.f32 %v651_v11, %v459_v7  ;;  %v776_v18 = vmul.f32 %v648_v63, %v456_v52  ;;  %v784_v19 = vmul.f32 %v656_v34, %v464_v59  ;;  %v778_v21 = vmul.f32 %v650_v10, %v458_v6  ;;  %v367_v52 = vld [vmem:[#allocation8 + $0x158] sm:$0xff] }
 0x10b   :  { %v1006_v3 = vpack.c.bf16 %v913_v14, %v905_v13  ;;  %v787_v22 = vmul.f32 %v659_v16, %v467_v9  ;;  %v786_v23 = vmul.f32 %v658_v15, %v466_v8  ;;  %v280_v24 = vunpack.c.l.bf16 %v2160_v12  ;;  %v559_v59 = vld [vmem:[#allocation9 + $0x158] sm:$0xff]  ;;  %v2172_v14 = vld [vmem:[#allocation6 + $0x1b0] sm:$0xff] }
 0x10c   :  { %v907_v27 = vadd.f32 %v779_v17, %v267_v4  ;;  %v904_v28 = vadd.f32 %v776_v18, %v264_v32  ;;  %v912_v29 = vadd.f32 %v784_v19, %v272_v46  ;;  %v906_v30 = vadd.f32 %v778_v21, %v266_v2  ;;  %v563_v34 = vld [vmem:[#allocation9 + $0x178] sm:$0xff]  ;;  %v374_v19 = vld [vmem:[#allocation8 + $0x190] sm:$0xff] }
 0x10d   :  { %1149 = vmatprep.subr.bf16.mxu0 %v1006_v3  ;;  %v915_v33 = vadd.f32 %v787_v22, %v275_v57  ;;  %v914_v35 = vadd.f32 %v786_v23, %v274_v44  ;;  %v281_v36 = vunpack.c.h.bf16 %v2160_v12  ;;  %v288_v37 = vunpack.c.l.bf16 %v2162_v53  ;;  %v378_v23 = vld [vmem:[#allocation8 + $0x1b0] sm:$0xff]  ;;  %v187_v12 = vld [vmem:[#allocation6 + $0x1b8] sm:$0xff] }
 0x10e   :  { %v1005_v41 = vpack.c.bf16 %v912_v29, %v904_v28  ;;  %v289_v43 = vunpack.c.h.bf16 %v2162_v53  ;;  %v472_v45 = vunpack.c.l.bf16 %v366_v25  ;;  %v473_v47 = vunpack.c.h.bf16 %v366_v25 }
 0x10f   :  { %v1008_v32 = vpack.c.bf16 %v915_v33, %v907_v27  ;;  %v1007_v46 = vpack.c.bf16 %v914_v35, %v906_v30  ;;  %v480_v50 = vunpack.c.l.bf16 %v370_v31  ;;  %v481_v51 = vunpack.c.h.bf16 %v370_v31  ;;  %v566_v30 = vld [vmem:[#allocation9 + $0x190] sm:$0xff] }
 0x110   :  { %1150 = vmatpush1.bf16.xpose.msra.mxu0 %v1005_v41  ;;  %v664_v55 = vunpack.c.l.bf16 %v558_v38  ;;  %v665_v56 = vunpack.c.h.bf16 %v558_v38  ;;  %v672_v26 = vunpack.c.l.bf16 %v562_v39  ;;  %v673_v40 = vunpack.c.h.bf16 %v562_v39  ;;  %v570_v31 = vld [vmem:[#allocation9 + $0x1b0] sm:$0xff]  ;;  %v183_v39 = vld [vmem:[#allocation6 + $0x198] sm:$0xff] }
 0x111   :  { %1189 = vmatprep.subr.bf16.mxu1 %v1008_v32  ;;  %v282_v60 = vunpack.c.l.bf16 %v175_v48  ;;  %v283_v61 = vunpack.c.h.bf16 %v175_v48  ;;  %v290_v63 = vunpack.c.l.bf16 %v179_v20  ;;  %v291_v0 = vunpack.c.h.bf16 %v179_v20 }
 0x112   :  { %1190 = vmatpush1.bf16.xpose.msra.mxu1 %v1007_v46  ;;  %v793_v49 = vmul.f32 %v665_v56, %v473_v47  ;;  %v801_v62 = vmul.f32 %v673_v40, %v481_v51  ;;  %v474_v1 = vunpack.c.l.bf16 %v367_v52  ;;  %v475_v2 = vunpack.c.h.bf16 %v367_v52  ;;  %v379_v46 = vld [vmem:[#allocation8 + $0x1b8] sm:$0xff] }
 0x113   :  { %v482_v4 = vunpack.c.l.bf16 %v371_v54  ;;  %v483_v44 = vunpack.c.h.bf16 %v371_v54  ;;  %v666_v57 = vunpack.c.l.bf16 %v559_v59  ;;  %v667_v42 = vunpack.c.h.bf16 %v559_v59 }
 0x114   :  { %v921_v5 = vadd.f32 %v793_v49, %v281_v36  ;;  %v929_v6 = vadd.f32 %v801_v62, %v289_v43  ;;  %v674_v7 = vunpack.c.l.bf16 %v563_v34  ;;  %v675_v8 = vunpack.c.h.bf16 %v563_v34  ;;  %v2180_v49 = vld [vmem:[#allocation6 + $0x1d0] sm:$0xff] }
 0x115   :  { %v795_v9 = vmul.f32 %v667_v42, %v475_v2  ;;  %v792_v10 = vmul.f32 %v664_v55, %v472_v45  ;;  %v800_v11 = vmul.f32 %v672_v26, %v480_v50  ;;  %v794_v13 = vmul.f32 %v666_v57, %v474_v1  ;;  %v375_v45 = vld [vmem:[#allocation8 + $0x198] sm:$0xff] }
 0x116   :  { %v1014_v15 = vpack.c.bf16 %v929_v6, %v921_v5  ;;  %v803_v16 = vmul.f32 %v675_v8, %v483_v44  ;;  %v802_v17 = vmul.f32 %v674_v7, %v482_v4  ;;  %v296_v18 = vunpack.c.l.bf16 %v2170_v58  ;;  %v567_v50 = vld [vmem:[#allocation9 + $0x198] sm:$0xff]  ;;  %v2182_v6 = vld [vmem:[#allocation6 + $0x1f0] sm:$0xff] }
 0x117   :  { %v923_v21 = vadd.f32 %v795_v9, %v283_v61  ;;  %v920_v53 = vadd.f32 %v792_v10, %v280_v24  ;;  %v928_v3 = vadd.f32 %v800_v11, %v288_v37  ;;  %v922_v22 = vadd.f32 %v794_v13, %v282_v60  ;;  %v571_v26 = vld [vmem:[#allocation9 + $0x1b8] sm:$0xff]  ;;  %v382_v11 = vld [vmem:[#allocation8 + $0x1d0] sm:$0xff] }
 0x118   :  { %1151 = vmatprep.subr.bf16.mxu0 %v1014_v15  ;;  %v931_v25 = vadd.f32 %v803_v16, %v291_v0  ;;  %v930_v27 = vadd.f32 %v802_v17, %v290_v63  ;;  %v297_v28 = vunpack.c.h.bf16 %v2170_v58  ;;  %v304_v29 = vunpack.c.l.bf16 %v2172_v14  ;;  %v386_v17 = vld [vmem:[#allocation8 + $0x1f0] sm:$0xff]  ;;  %v195_v58 = vld [vmem:[#allocation6 + $0x1f8] sm:$0xff] }
 0x119   :  { %v1013_v33 = vpack.c.bf16 %v928_v3, %v920_v53  ;;  %v305_v35 = vunpack.c.h.bf16 %v2172_v14  ;;  %v488_v36 = vunpack.c.l.bf16 %v374_v19  ;;  %v489_v38 = vunpack.c.h.bf16 %v374_v19 }
 0x11a   :  { %v1016_v24 = vpack.c.bf16 %v931_v25, %v923_v21  ;;  %v1015_v37 = vpack.c.bf16 %v930_v27, %v922_v22  ;;  %v496_v41 = vunpack.c.l.bf16 %v378_v23  ;;  %v497_v43 = vunpack.c.h.bf16 %v378_v23  ;;  %v574_v22 = vld [vmem:[#allocation9 + $0x1d0] sm:$0xff] }
 0x11b   :  { %1152 = vmatpush1.bf16.xpose.msra.mxu0 %v1013_v33  ;;  %v680_v47 = vunpack.c.l.bf16 %v566_v30  ;;  %v681_v48 = vunpack.c.h.bf16 %v566_v30  ;;  %v688_v20 = vunpack.c.l.bf16 %v570_v31  ;;  %v689_v32 = vunpack.c.h.bf16 %v570_v31  ;;  %v578_v23 = vld [vmem:[#allocation9 + $0x1f0] sm:$0xff]  ;;  %v191_v31 = vld [vmem:[#allocation6 + $0x1d8] sm:$0xff] }
 0x11c   :  { %1191 = vmatprep.subr.bf16.mxu1 %v1016_v24  ;;  %v298_v51 = vunpack.c.l.bf16 %v183_v39  ;;  %v299_v52 = vunpack.c.h.bf16 %v183_v39  ;;  %v306_v55 = vunpack.c.l.bf16 %v187_v12  ;;  %v307_v56 = vunpack.c.h.bf16 %v187_v12 }
 0x11d   :  { %1192 = vmatpush1.bf16.xpose.msra.mxu1 %v1015_v37  ;;  %v809_v40 = vmul.f32 %v681_v48, %v489_v38  ;;  %v817_v54 = vmul.f32 %v689_v32, %v497_v43  ;;  %v490_v59 = vunpack.c.l.bf16 %v375_v45  ;;  %v491_v60 = vunpack.c.h.bf16 %v375_v45  ;;  %v387_v37 = vld [vmem:[#allocation8 + $0x1f8] sm:$0xff] }
 0x11e   :  { %v498_v61 = vunpack.c.l.bf16 %v379_v46  ;;  %v499_v63 = vunpack.c.h.bf16 %v379_v46  ;;  %v682_v0 = vunpack.c.l.bf16 %v567_v50  ;;  %v683_v34 = vunpack.c.h.bf16 %v567_v50 }
 0x11f   :  { %v937_v62 = vadd.f32 %v809_v40, %v297_v28  ;;  %v945_v1 = vadd.f32 %v817_v54, %v305_v35  ;;  %v690_v2 = vunpack.c.l.bf16 %v571_v26  ;;  %v691_v4 = vunpack.c.h.bf16 %v571_v26 }
 0x120   :  { %v811_v44 = vmul.f32 %v683_v34, %v491_v60  ;;  %v808_v57 = vmul.f32 %v680_v47, %v488_v36  ;;  %v816_v42 = vmul.f32 %v688_v20, %v496_v41  ;;  %v810_v5 = vmul.f32 %v682_v0, %v490_v59  ;;  %v383_v36 = vld [vmem:[#allocation8 + $0x1d8] sm:$0xff] }
 0x121   :  { %v1022_v7 = vpack.c.bf16 %v945_v1, %v937_v62  ;;  %v819_v8 = vmul.f32 %v691_v4, %v499_v63  ;;  %v818_v9 = vmul.f32 %v690_v2, %v498_v61  ;;  %v312_v10 = vunpack.c.l.bf16 %v2180_v49  ;;  %v575_v41 = vld [vmem:[#allocation9 + $0x1d8] sm:$0xff] }
 0x122   :  { %v939_v13 = vadd.f32 %v811_v44, %v299_v52  ;;  %v936_v14 = vadd.f32 %v808_v57, %v296_v18  ;;  %v944_v15 = vadd.f32 %v816_v42, %v304_v29  ;;  %v938_v16 = vadd.f32 %v810_v5, %v298_v51  ;;  %v579_v20 = vld [vmem:[#allocation9 + $0x1f8] sm:$0xff] }
 0x123   :  { %1153 = vmatprep.subr.bf16.mxu0 %v1022_v7  ;;  %v947_v19 = vadd.f32 %v819_v8, %v307_v56  ;;  %v946_v21 = vadd.f32 %v818_v9, %v306_v55  ;;  %v313_v53 = vunpack.c.h.bf16 %v2180_v49  ;;  %v320_v3 = vunpack.c.l.bf16 %v2182_v6  ;;  %v967_v49 = vld [vmem:[#allocation3 + $0x10] sm:$0xff]  ;;  %v968_v4 = vld [vmem:[#allocation3 + $0x18] sm:$0xff] }
 0x124   :  { %v1021_v25 = vpack.c.bf16 %v944_v15, %v936_v14  ;;  %v321_v27 = vunpack.c.h.bf16 %v2182_v6  ;;  %v504_v28 = vunpack.c.l.bf16 %v382_v11  ;;  %v505_v30 = vunpack.c.h.bf16 %v382_v11 }
 0x125   :  { %v1024_v18 = vpack.c.bf16 %v947_v19, %v939_v13  ;;  %v1023_v29 = vpack.c.bf16 %v946_v21, %v938_v16  ;;  %v512_v33 = vunpack.c.l.bf16 %v386_v17  ;;  %v513_v35 = vunpack.c.h.bf16 %v386_v17  ;;  %v1450_v17 = vld [vmem:[#allocation11] sm:$0xff]  }
 0x126   :  { %1154 = vmatpush1.bf16.xpose.msra.mxu0 %v1021_v25  ;;  %v696_v38 = vunpack.c.l.bf16 %v574_v22  ;;  %v697_v39 = vunpack.c.h.bf16 %v574_v22  ;;  %v704_v12 = vunpack.c.l.bf16 %v578_v23  ;;  %v705_v24 = vunpack.c.h.bf16 %v578_v23  ;;  %v1514_v19 = vld [vmem:[#allocation14] sm:$0xff]   ;;  %v1552_v22 = vld [vmem:[#allocation12 + $0x8] sm:$0xff]  }
 0x127   :  { %1193 = vmatprep.subr.bf16.mxu1 %v1024_v18  ;;  %v314_v43 = vunpack.c.l.bf16 %v191_v31  ;;  %v315_v45 = vunpack.c.h.bf16 %v191_v31  ;;  %v322_v47 = vunpack.c.l.bf16 %v195_v58  ;;  %v323_v48 = vunpack.c.h.bf16 %v195_v58  ;;  %v1559_v23 = vld [vmem:[#allocation14 + $0x8] sm:$0xff]  }
 0x128   :  { %1194 = vmatpush1.bf16.xpose.msra.mxu1 %v1023_v29  ;;  %v825_v32 = vmul.f32 %v697_v39, %v505_v30  ;;  %v833_v46 = vmul.f32 %v705_v24, %v513_v35  ;;  %v506_v50 = vunpack.c.l.bf16 %v383_v36  ;;  %v507_v51 = vunpack.c.h.bf16 %v383_v36  ;;  %v1545_v31 = vld [vmem:[#allocation11 + $0x8] sm:$0xff]  }
 0x129   :  { %v514_v52 = vunpack.c.l.bf16 %v387_v37  ;;  %v515_v55 = vunpack.c.h.bf16 %v387_v37  ;;  %v698_v56 = vunpack.c.l.bf16 %v575_v41  ;;  %v699_v26 = vunpack.c.h.bf16 %v575_v41 }
 0x12a   :  { %v953_v40 = vadd.f32 %v825_v32, %v313_v53  ;;  %v961_v54 = vadd.f32 %v833_v46, %v321_v27  ;;  %v706_v59 = vunpack.c.l.bf16 %v579_v20  ;;  %v707_v60 = vunpack.c.h.bf16 %v579_v20 }
 0x12b   :  { %v827_v61 = vmul.f32 %v699_v26, %v507_v51  ;;  %v824_v63 = vmul.f32 %v696_v38, %v504_v28  ;;  %v832_v0 = vmul.f32 %v704_v12, %v512_v33  ;;  %v826_v34 = vmul.f32 %v698_v56, %v506_v50  ;;  %v1546_v50 = vld [vmem:[#allocation11 + $0x10] sm:$0xff]  }
 0x12c   :  { %v1030_v62 = vpack.c.bf16 %v961_v54, %v953_v40  ;;  %v835_v1 = vmul.f32 %v707_v60, %v515_v55  ;;  %v834_v2 = vmul.f32 %v706_v59, %v514_v52  ;;  %v1444_v8 = vcombine.high %v967_v49, %v967_v49  ;;  %v1554_v59 = vld [vmem:[#allocation12 + $0x18] sm:$0xff]  }
 0x12d   :  { %v955_v44 = vadd.f32 %v827_v61, %v315_v45  ;;  %v952_v57 = vadd.f32 %v824_v63, %v312_v10  ;;  %v960_v42 = vadd.f32 %v832_v0, %v320_v3  ;;  %v954_v5 = vadd.f32 %v826_v34, %v314_v43  ;;  %v1482_v10 = vld [vmem:[#allocation12] sm:$0xff]   ;;  %v1553_v43 = vld [vmem:[#allocation12 + $0x10] sm:$0xff]   ;;  %v1561_v60 = vld [vmem:[#allocation14 + $0x18] sm:$0xff]  }
 0x12e   :  { %1155 = vmatprep.subr.bf16.mxu0 %v1030_v62  ;;  %v963_v6 = vadd.f32 %v835_v1, %v323_v48  ;;  %v962_v7 = vadd.f32 %v834_v2, %v322_v47  ;;  %v1446_v11 = vcombine.high %v968_v4, %v968_v4  ;;  %1173 = vmatprep.mubr.bf16.mxu0 %v1444_v8  ;;  %v1814_v21 = vmov 0.0   ;;  %v1560_v45 = vld [vmem:[#allocation14 + $0x10] sm:$0xff]  }
 0x12f   :  { %v1029_v9 = vpack.c.bf16 %v960_v42, %v952_v57  ;;  %v1443_v15 = vcombine.low %v967_v49, %v967_v49  ;;  %v1445_v16 = vcombine.low %v968_v4, %v968_v4  ;;  %v1483_v53 = vunpack.c.l.bf16 %v1482_v10  ;;  %v1547_v49 = vld [vmem:[#allocation11 + $0x18] sm:$0xff]  }
 0x130   :  { %v1032_v13 = vpack.c.bf16 %v963_v6, %v955_v44  ;;  %v1031_v14 = vpack.c.bf16 %v962_v7, %v954_v5  ;;  %1213 = vmatprep.mubr.bf16.mxu1 %v1446_v11  ;;  %v1484_v3 = vunpack.c.h.bf16 %v1482_v10  ;;  %v1451_v25 = vunpack.c.l.bf16 %v1450_v17  ;;  %v1555_v5 = vld [vmem:[#allocation12 + $0x20] sm:$0xff]  }
 0x131   :  { %1156 = vmatpush1.bf16.xpose.msra.mxu0 %v1029_v9  ;;  %v1452_v27 = vunpack.c.h.bf16 %v1450_v17  ;;  %v1515_v28 = vunpack.c.l.bf16 %v1514_v19  ;;  %v1516_v30 = vunpack.c.h.bf16 %v1514_v19  ;;  %v1487_v58 = vunpack.c.l.bf16 %v1552_v22  ;;  %v1562_v6 = vld [vmem:[#allocation14 + $0x20] sm:$0xff]  }
 0x132   :  { %1195 = vmatprep.subr.bf16.mxu1 %v1032_v13  ;;  %1575 = vmatprep.subr.bf16.mxu0 %v1814_v21  ;;  %v1488_v18 = vunpack.c.h.bf16 %v1552_v22  ;;  %v1519_v29 = vunpack.c.l.bf16 %v1559_v23  ;;  %v1520_v33 = vunpack.c.h.bf16 %v1559_v23  ;;  %v1455_v38 = vunpack.c.l.bf16 %v1545_v31  ;;  %v1548_v13 = vld [vmem:[#allocation11 + $0x20] sm:$0xff]   ;;  %v1563_v22 = vld [vmem:[#allocation14 + $0x28] sm:$0xff]  }
 0x133   :  { %1196 = vmatpush1.bf16.xpose.msra.mxu1 %v1031_v14  ;;  %v1332_v35 = vmul.f32 %v1515_v28, %v1483_v53  ;;  %v1333_v36 = vmul.f32 %v1516_v30, %v1484_v3  ;;  %v1456_v39 = vunpack.c.h.bf16 %v1545_v31  ;;  %v1491_v48 = vunpack.c.l.bf16 %v1553_v43  ;;  %v1556_v3 = vld [vmem:[#allocation12 + $0x28] sm:$0xff]  }
 0x134   :  { %v1334_v37 = vmul.f32 %v1519_v29, %v1487_v58  ;;  %v1335_v41 = vmul.f32 %v1520_v33, %v1488_v18  ;;  %v1492_v20 = vunpack.c.h.bf16 %v1553_v43  ;;  %v1523_v51 = vunpack.c.l.bf16 %v1560_v45  ;;  %v1549_v30 = vld [vmem:[#allocation11 + $0x28] sm:$0xff]   ;;  %v1550_v43 = vld [vmem:[#allocation11 + $0x30] sm:$0xff]  }
 0x135   :  { %v1348_v12 = vadd.f32 %v1451_v25, %v1332_v35  ;;  %v1349_v24 = vadd.f32 %v1452_v27, %v1333_v36  ;;  %v1524_v52 = vunpack.c.h.bf16 %v1560_v45  ;;  %v1459_v55 = vunpack.c.l.bf16 %v1546_v50 }
 0x136   :  { %v1350_v32 = vadd.f32 %v1455_v38, %v1334_v37  ;;  %v1351_v46 = vadd.f32 %v1456_v39, %v1335_v41  ;;  %v1460_v26 = vunpack.c.h.bf16 %v1546_v50  ;;  %v1336_v40 = vmul.f32 %v1523_v51, %v1491_v48  ;;  %v1557_v38 = vld [vmem:[#allocation12 + $0x30] sm:$0xff]  }
 0x137   :  { %v1365_v47 = vpack.c.bf16 %v1349_v24, %v1348_v12  ;;  %v1337_v54 = vmul.f32 %v1524_v52, %v1492_v20  ;;  %v1495_v61 = vunpack.c.l.bf16 %v1554_v59  ;;  %v1496_v63 = vunpack.c.h.bf16 %v1554_v59  ;;  %v1564_v39 = vld [vmem:[#allocation14 + $0x30] sm:$0xff]  }
 0x138   :  { %1174 = vmatmul.mubr.bf16.vlgmr.msra.gmra.mrb[4].mxu0 %v1443_v15  ;;  %v1366_v56 = vpack.c.bf16 %v1351_v46, %v1350_v32  ;;  %v1352_v0 = vadd.f32 %v1459_v55, %v1336_v40  ;;  %v1527_v62 = vunpack.c.l.bf16 %v1561_v60  ;;  %v1528_v1 = vunpack.c.h.bf16 %v1561_v60 }
 0x139   :  { %1576 = vmatpush3.bf16.xpose.msra.mxu0 %v1365_v47  ;;  %v1353_v34 = vadd.f32 %v1460_v26, %v1337_v54  ;;  %v1463_v2 = vunpack.c.l.bf16 %v1547_v49  ;;  %v1464_v44 = vunpack.c.h.bf16 %v1547_v49  ;;  %v1499_v7 = vunpack.c.l.bf16 %v1555_v5  ;;  %v1565_v26 = vld [vmem:[#allocation14 + $0x38] sm:$0xff]   ;;  %1591 = vmatprep.mubr.msk.bf16.mxu0 %vm1815_vm0, %v1814_v21 }
 0x13a   :  { %1214 = vmatmul.mubr.bf16.vlgmr.msra.gmra.mrb[4].mxu1 %v1445_v16  ;;  %1577 = vmatprep.subr.bf16.mxu0 %v1814_v21  ;;  %v1338_v57 = vmul.f32 %v1527_v62, %v1495_v61  ;;  %v1339_v42 = vmul.f32 %v1528_v1, %v1496_v63  ;;  %v1500_v8 = vunpack.c.h.bf16 %v1555_v5  ;;  %v1531_v14 = vunpack.c.l.bf16 %v1562_v6  ;;  %v1551_v61 = vld [vmem:[#allocation11 + $0x38] sm:$0xff]  }
 0x13b   :  { %v1367_v4 = vpack.c.bf16 %v1353_v34, %v1352_v0  ;;  %v1532_v15 = vunpack.c.h.bf16 %v1562_v6  ;;  %v1467_v16 = vunpack.c.l.bf16 %v1548_v13  ;;  %v1468_v10 = vunpack.c.h.bf16 %v1548_v13 }
 0x13c   :  { %v1354_v9 = vadd.f32 %v1463_v2, %v1338_v57  ;;  %v1355_v11 = vadd.f32 %v1464_v44, %v1339_v42  ;;  %v1340_v19 = vmul.f32 %v1531_v14, %v1499_v7  ;;  %v1503_v23 = vunpack.c.l.bf16 %v1556_v3 }
 0x13d   :  { %v1341_v53 = vmul.f32 %v1532_v15, %v1500_v8  ;;  %v1504_v25 = vunpack.c.h.bf16 %v1556_v3  ;;  %v1535_v31 = vunpack.c.l.bf16 %v1563_v22  ;;  %v1536_v58 = vunpack.c.h.bf16 %v1563_v22 }
 0x13e   :  { %v1368_v17 = vpack.c.bf16 %v1355_v11, %v1354_v9  ;;  %v1356_v27 = vadd.f32 %v1467_v16, %v1340_v19  ;;  %v1471_v18 = vunpack.c.l.bf16 %v1549_v30  ;;  %v1472_v33 = vunpack.c.h.bf16 %v1549_v30  ;;  %v1447_v16 = vld [vmem:[%s2221_s4] ss:$0 sm:$0xff]  ;;  %s1771_s4 = scalar_lea.vmem %s1428_s12, 128 }
 0x13f   :  { %v1357_v28 = vadd.f32 %v1468_v10, %v1341_v53  ;;  %v1342_v35 = vmul.f32 %v1535_v31, %v1503_v23  ;;  %v1343_v36 = vmul.f32 %v1536_v58, %v1504_v25  ;;  %v1507_v12 = vunpack.c.l.bf16 %v1557_v38  ;;  %p1772_p0 = scmp.ne.s32.totalorder %s1428_s12, %s1771_s4  ;;  %p1777_p2 = scmp.lt.s32.totalorder %s1771_s4, %s1771_s4 }
 0x140   :  { %v1508_v24 = vunpack.c.h.bf16 %v1557_v38  ;;  %v1539_v45 = vunpack.c.l.bf16 %v1564_v39  ;;  %v1540_v47 = vunpack.c.h.bf16 %v1564_v39  ;;  %v1475_v48 = vunpack.c.l.bf16 %v1550_v43 }
 0x141   :  { %1578 = vmatpush3.bf16.xpose.msra.mxu0 %v1366_v56  ;;  %v1369_v29 = vpack.c.bf16 %v1357_v28, %v1356_v27  ;;  %v1358_v37 = vadd.f32 %v1471_v18, %v1342_v35  ;;  %v1359_v41 = vadd.f32 %v1472_v33, %v1343_v36  ;;  %v1476_v32 = vunpack.c.h.bf16 %v1550_v43  ;;  %v1558_v56 = vld [vmem:[#allocation12 + $0x38] sm:$0xff]   ;;  %v1448_v27 = vld [vmem:[%s2225_s8] ss:$0 sm:$0xff]  ;;  %p1778_p3 = por %p1777_p2, %p1776_p1 }
 0x142   :  { %1579 = vmatprep.subr.bf16.mxu0 %v1814_v21  ;;  %v1344_v46 = vmul.f32 %v1539_v45, %v1507_v12  ;;  %v1345_v50 = vmul.f32 %v1540_v47, %v1508_v24  ;;  %v1511_v40 = vunpack.c.l.bf16 %v1558_v56  ;;  %v1512_v54 = vunpack.c.h.bf16 %v1558_v56 }
 0x143   :  { %v1370_v20 = vpack.c.bf16 %v1359_v41, %v1358_v37  ;;  %v1543_v59 = vunpack.c.l.bf16 %v1565_v26  ;;  %v1544_v60 = vunpack.c.h.bf16 %v1565_v26  ;;  %v1479_v63 = vunpack.c.l.bf16 %v1551_v61  ;;  %p1779_p4 = pnand %p1778_p3, %p1772_p0 }
 0x144   :  { %v1360_v51 = vadd.f32 %v1475_v48, %v1344_v46  ;;  %v1361_v52 = vadd.f32 %v1476_v32, %v1345_v50  ;;  %v1480_v0 = vunpack.c.h.bf16 %v1551_v61 }
 0x145   :  { %v1346_v34 = vmul.f32 %v1543_v59, %v1511_v40  ;;  %v1347_v49 = vmul.f32 %v1544_v60, %v1512_v54 }
 0x146   :  { %v1371_v55 = vpack.c.bf16 %v1361_v52, %v1360_v51 }
 0x147   :  { %v1362_v62 = vadd.f32 %v1479_v63, %v1346_v34  ;;  %v1363_v1 = vadd.f32 %v1480_v0, %v1347_v49 }
 0x149   :  { %1580 = vmatpush3.bf16.xpose.msra.mxu0 %v1367_v4  ;;  %v1372_v2 = vpack.c.bf16 %v1363_v1, %v1362_v62 }
 0x14a   :  { %1581 = vmatprep.subr.bf16.mxu0 %v1814_v21 }
 0x151   :  { %1582 = vmatpush3.bf16.xpose.msra.mxu0 %v1368_v17 }
 0x152   :  { %1583 = vmatprep.subr.bf16.mxu0 %v1814_v21 }
 0x159   :  { %1584 = vmatpush3.bf16.xpose.msra.mxu0 %v1369_v29 }
 0x15a   :  { %1585 = vmatprep.subr.bf16.mxu0 %v1814_v21 }
 0x161   :  { %1586 = vmatpush3.bf16.xpose.msra.mxu0 %v1370_v20 }
 0x162   :  { %1587 = vmatprep.subr.bf16.mxu0 %v1814_v21 }
 0x169   :  { %1588 = vmatpush3.bf16.xpose.msra.mxu0 %v1371_v55 }
 0x16a   :  { %1589 = vmatprep.subr.bf16.mxu0 %v1814_v21 }
 0x171   :  { %1590 = vmatpush3.bf16.xpose.msra.mxu0 %v1372_v2 }
 0x1b2   :  { %v1095_v4 = vpop.f32.mrb[0].mxu0 }
 0x1b3   :  { %v1097_v44 = vpop.f32.mrb[1].mxu0 }
 0x1b4   :  { %v1098_v57 = vpop.f32.mrb[2].mxu0 }
 0x1b5   :  { %v1135_v42 = vpop.f32.mrb[0].mxu1  ;;  %v1099_v5 = vpop.f32.mrb[3].mxu0 }
 0x1b6   :  { %v1136_v6 = vadd.f32 %v1135_v42, %v1095_v4  ;;  %v1137_v7 = vpop.f32.mrb[1].mxu1 }
 0x1b7   :  { %v1138_v8 = vpop.f32.mrb[2].mxu1 }
 0x1b8   :  { %v1139_v9 = vpop.f32.mrb[3].mxu1 }
 0x20b   :  { %v1175_v11 = vpop.f32.mrb[4].mxu0 }
 0x20c   :  { %v1176_v13 = vadd.f32 %v1175_v11, %v1136_v6  ;;  %v1177_v14 = vpop.f32.mrb[5].mxu0 }
 0x20d   :  { %v1215_v15 = vpop.f32.mrb[4].mxu1  ;;  %v1178_v17 = vpop.f32.mrb[6].mxu0 }
 0x20e   :  { %v1216_v10 = vadd.f32 %v1215_v15, %v1176_v13  ;;  %v1217_v21 = vpop.f32.mrb[5].mxu1  ;;  %v1179_v19 = vpop.f32.mrb[7].mxu0 }
 0x20f   :  { %v1218_v53 = vpop.f32.mrb[6].mxu1 }
 0x210   :  { %v1234_v3 = vadd.f32 %v1447_v16, %v1216_v10  ;;  %v1219_v22 = vpop.f32.mrb[7].mxu1 }
 0x212   :  { %v1235_v23 = vmax.f32 %v1234_v3, 0.0 }
 0x214   :  { %v1364_v25 = vpack.c.bf16 %v1235_v23, %v1235_v23 }
 0x216   :  { %1592 = vmatmul.mubr.bf16.vlgmr.msra.gmra.mrb[8].mxu0 %v1364_v25 }
 0x2e9   :  { %v1414_v28 = vpop.f32.mrb[8].mxu0 }
 0x2ea   :  { %v1415_v30 = vadd.f32 %v1448_v27, %v1414_v28  ;;  %v1593_v31 = vpop.f32.mrb[9].mxu0 }
 0x2eb   :  { %v1417_v58 = vpop.f32.mrb[10].mxu0 }
 0x2ec   :  { %1420 = vst [vmem:[#allocation15] sm:$0xff] %v1415_v30  ;;  %v1594_v18 = vpop.f32.mrb[11].mxu0 }
 0x2ed   :  { %1782 = shalt.err (!%p1779_p4)
}
 0x2ee   :  { %s1783_s8 = scalar_lea.hbm %s2226_s9, 128 }
 0x2ef   :  { %p1784_p5 = scmp.ne.s32.totalorder %s2226_s9, %s1783_s8  ;;  %p1787_p6 = scmp.lt.u32.totalorder %s1783_s8, %s2226_s9 }
 0x2f1   :  { %p1789_p7 = pnand %p1787_p6, %p1784_p5 }
 0x2f3   :  { %1792 = shalt.err (!%p1789_p7)
}
 0x2f4   :  { %1430 = dma.vmem_to_hbm [thread:$0]  %s1428_s12, 128, %s2226_s9, [#allocation5]  }
 0x2f5   :  { %1801 = dma.done.wait [#allocation5], 128  }
 0x2f6   :  { %1802 = vsyncadd [#allocation5], 4294967168 }
 0x2f7   :  { %1434 = vsyncpa [#allocation4], 1 }
 0x2f8   :  { %1435 = vsyncpa [#allocation7], 1 }
 0x2f9   :  { %1436 = vsyncpa [#allocation10], 1 }
 0x2fa   :  { %1437 = vsyncpa [#allocation13], 1 }
 0x2fb   :  { %1438 = vsyncpa [#allocation5], 1 }

</bundles_post_ra>
